<compile_context>
chip_gen: v7x
topology: tpu7x:2x2x1
jax: 0.10.0
libtpu: 0.0.40
codegen_flags: <defaults>
</compile_context>

<pallas_src>
import functools
import math

import numpy as np
import jax
import jax.numpy as jnp
from jax import lax
from jax.experimental import pallas as pl
from jax.experimental.pallas import tpu as pltpu

BN_EPS = 1e-5


def _relu6(x):
    return jnp.clip(x, 0.0, 6.0)


# ---------------------------------------------------------------------------
# Fused Pallas kernel (whole block, one batch element per grid step)
# ---------------------------------------------------------------------------

def _make_fused_kernel(H, W, Cin, Cbn, KH, KW, dil, r, C, Cse, cdt):
    HW = H * W
    p = dil * (KH - 1) // 2
    off = p * W + p                      # lane offset of real data in padded input
    rr = r * r
    Cpre = Cbn * rr                      # conv2 output channels (pre-shuffle)
    Cful = C * rr                        # conv3 / residual channels (pre-shuffle)

    def kernel(x_ref, mask_ref, w1_ref, b1_ref, w2_ref, b2_ref, w3_ref, b3_ref,
               wu_ref, bu_ref, wse1_ref, wse2_ref, o_ref):
        xp = x_ref[0]                                     # (Cin, HWp) compute dtype

        # ---- conv1 (1x1) + bn1 + relu6.  Computed on the padded width; pad
        #      columns hold garbage that the tap masks zero out later. --------
        y1 = jnp.dot(w1_ref[...], xp, preferred_element_type=jnp.float32)
        y1 = jnp.clip(y1 + b1_ref[...], 0.0, 6.0)         # (Cbn, HWp) f32

        # ---- conv2 (kxk, dilated, stride 1): KH*KW lane-shifted taps -> MXU,
        #      accumulated in one f32 VMEM accumulator (no retiling copies). --
        acc = jnp.zeros((Cpre, HW), jnp.float32)
        for kh in range(KH):
            for kw in range(KW):
                t = kh * KW + kw
                s = (kh * dil - p) * W + (kw * dil - p)   # flat spatial shift
                tap = y1[:, off + s: off + s + HW] * mask_ref[t]
                acc = acc + jnp.dot(w2_ref[t], tap.astype(cdt),
                                    preferred_element_type=jnp.float32)
        y2 = jnp.clip(acc + b2_ref[...], 0.0, 6.0)        # bn2 + relu6 (pre-shuffle)

        # ---- conv3 (1x1) + bn3 (weight expanded to pre-shuffle layout) ------
        z = jnp.dot(w3_ref[...], y2.astype(cdt),
                    preferred_element_type=jnp.float32) + b3_ref[...]   # (Cful, HW)

        # ---- upsample residual branch (subpixel 1x1 + bnu, or identity) -----
        x_c = xp[:, off: off + HW]
        res = jnp.dot(wu_ref[...], x_c,
                      preferred_element_type=jnp.float32) + bu_ref[...]  # (Cful, HW)

        # ---- SE gate (tiny, kept f32).  Layer 1 contracts against z directly
        #      so the matmul keeps HW as its lane dimension (mean and the
        #      linear map commute); layer 2 is unrolled over the small
        #      bottleneck dim, avoiding a degenerate N=1 matmul. --------------
        hse = jnp.dot(wse1_ref[...], z, preferred_element_type=jnp.float32)
        hse = jnp.clip(jnp.mean(hse, axis=1, keepdims=True), 0.0, 6.0)   # (Cse, 1)
        wse2 = wse2_ref[...]
        logits = jnp.zeros((Cful, 1), jnp.float32)
        for d in range(Cse):
            logits = logits + wse2[:, d:d + 1] * hse[d:d + 1, :]
        gate = jax.nn.sigmoid(logits)                     # (Cful, 1)

        # ---- SE scale + residual add + relu6; lane-dense store --------------
        out = jnp.clip(z * gate + res, 0.0, 6.0)          # (Cful, HW)
        o_ref[...] = out[None, :, :].astype(o_ref.dtype)

    return kernel


# ---------------------------------------------------------------------------
# Wrapper: BN folding, pre-shuffle weight expansion, pallas_call, final shuffle
# ---------------------------------------------------------------------------

def fold_bn(bn):
    gamma, beta, mean, var = bn
    s = gamma / jnp.sqrt(var + BN_EPS)
    return s, beta - mean * s


def se_resnet2d_bn_dec_block(x_nchw, params, *, stride, dilation=1,
                             compute_dtype=jnp.bfloat16):
    n, cin, h, w = x_nchw.shape
    r = stride
    rr = r * r
    kh, kw, cbn, _ = params['w2'].shape
    c = params['w3'].shape[1]
    cse = params['w_se1'].shape[1]
    cpre = cbn * rr
    cful = c * rr
    hw = h * w
    p = dilation * (kh - 1) // 2
    off = p * w + p
    hwp = hw + 2 * off
    cdt = jnp.dtype(compute_dtype)

    # Fold eval-mode BN scales into the conv weights, transpose everything into
    # the channel-major kernel layout, and expand post-shuffle quantities to
    # the pre-shuffle channel order q = c*r^2 + i*r + j.
    # (In real use these folds would be done once, not per forward call.)
    s1, b1 = fold_bn(params['bn1'])
    s2, b2 = fold_bn(params['bn2'])
    s3, b3 = fold_bn(params['bn3'])

    w1t = (params['w1'] * s1[None, :]).T.astype(cdt)                    # (cbn, cin)
    b1c = b1[:, None]
    w2s = params['w2'] * jnp.repeat(s2, rr)[None, None, None, :]        # (kh,kw,cbn,cpre)
    w2t = jnp.transpose(w2s, (0, 1, 3, 2)).reshape(kh * kw, cpre, cbn).astype(cdt)
    b2c = jnp.repeat(b2, rr)[:, None]
    w3t = jnp.einsum('bc,gh->cgbh', params['w3'] * s3[None, :],
                     jnp.eye(rr, dtype=jnp.float32)).reshape(cful, cpre).astype(cdt)
    b3c = jnp.repeat(b3, rr)[:, None]

    if r != 1 or cin != c:
        su, bu = fold_bn(params['bnu'])
        wut = (params['wu'] * jnp.repeat(su, rr)[None, :]).T.astype(cdt)  # (cful, cin)
        buc = jnp.repeat(bu, rr)[:, None]
    else:                                   # identity residual branch
        wut = jnp.eye(cin, dtype=jnp.float32).astype(cdt)
        buc = jnp.zeros((cful, 1), jnp.float32)

    wse1t = (jnp.repeat(params['w_se1'], rr, axis=0) / float(rr)).T      # (cse, cful)
    wse2t = jnp.repeat(params['w_se2'], rr, axis=1).T                    # (cful, cse)

    # Precomputed 0/1 validity masks for the kxk taps (static, built in numpy).
    m = np.arange(hw)
    hpos, wpos = m // w, m % w
    masks_np = np.zeros((kh * kw, 1, hw), np.float32)
    for ikh in range(kh):
        for ikw in range(kw):
            dh, dw = ikh * dilation - p, ikw * dilation - p
            ok = ((hpos + dh >= 0) & (hpos + dh < h)
                  & (wpos + dw >= 0) & (wpos + dw < w))
            masks_np[ikh * kw + ikw, 0] = ok
    masks = jnp.asarray(masks_np)

    # Input: NCHW maps directly onto the (Cin, H*W) kernel tile.  The flattened
    # spatial axis is padded by `off` on both sides so every conv2 tap is a
    # plain static lane slice inside the kernel (pad content is masked; no
    # in-kernel halo handling and no jnp.pad of the big activations).
    x_in = jnp.pad(x_nchw.reshape(n, cin, hw), ((0, 0), (0, 0), (off, off)))
    x_in = x_in.astype(cdt)

    kernel = _make_fused_kernel(h, w, cin, cbn, kh, kw, dilation, r, c, cse, cdt)

    flops = 2 * n * (cin * cbn * hwp + kh * kw * cbn * cpre * hw
                     + cpre * cful * hw + cin * cful * hw + cse * cful * hw)
    bytes_accessed = int(n * cin * hwp * cdt.itemsize + n * cful * hw * 4
                         + (w1t.size + w2t.size + w3t.size + wut.size) * cdt.itemsize
                         + (wse1t.size + wse2t.size + masks.size) * 4)

    rep = lambda a: pl.BlockSpec(a.shape, lambda b: (0,) * a.ndim)  # resident operand

    out_pre = pl.pallas_call(
        kernel,
        out_shape=jax.ShapeDtypeStruct((n, cful, hw), jnp.float32),
        grid=(n,),
        in_specs=[
            pl.BlockSpec((1, cin, hwp), lambda b: (b, 0, 0)),
            rep(masks), rep(w1t), rep(b1c), rep(w2t), rep(b2c), rep(w3t),
            rep(b3c), rep(wut), rep(buc), rep(wse1t), rep(wse2t),
        ],
        out_specs=pl.BlockSpec((1, cful, hw), lambda b: (b, 0, 0)),
        compiler_params=pltpu.CompilerParams(
            dimension_semantics=("parallel",),
            vmem_limit_bytes=32 * 1024 * 1024),
        cost_estimate=pl.CostEstimate(flops=flops, transcendentals=n * cful,
                                      bytes_accessed=bytes_accessed),
    )(x_in, masks, w1t, b1c, w2t, b2c, w3t, b3c, wut, buc, wse1t, wse2t)

    # Final pixel shuffle (pure permutation); output is already channel-major,
    # so this is the only layout op in the whole forward pass.
    out = out_pre.reshape(n, c, r, r, h, w).transpose(0, 1, 4, 2, 5, 3)
    return out.reshape(n, c, h * r, w * r)


# ---------------------------------------------------------------------------
# Pure-JAX reference (independent path via lax.conv_general_dilated)
# ---------------------------------------------------------------------------

def pixel_shuffle_nhwc(x, r):
    if r == 1:
        return x
    n, h, w, cr2 = x.shape
    c = cr2 // (r * r)
    x = x.reshape(n, h, w, c, r, r)
    x = x.transpose(0, 1, 4, 2, 5, 3)        # n, h, i, w, j, c
    return x.reshape(n, h * r, w * r, c)


def _conv_nhwc(x, w_hwio, dilation=1):
    khs = w_hwio.shape[0]
    pad = dilation * (khs - 1) // 2
    return lax.conv_general_dilated(
        x, w_hwio, window_strides=(1, 1),
        padding=[(pad, pad), (pad, pad)],
        rhs_dilation=(dilation, dilation),
        dimension_numbers=('NHWC', 'HWIO', 'NHWC'))


def reference_forward(x_nchw, params, *, stride, dilation=1):
    x = jnp.transpose(x_nchw, (0, 2, 3, 1))
    r = stride

    def bn(t, pbn):
        g, b, mm, v = pbn
        return (t - mm) / jnp.sqrt(v + BN_EPS) * g + b

    y = _relu6(bn(_conv_nhwc(x, params['w1'][None, None]), params['bn1']))
    y = _conv_nhwc(y, params['w2'], dilation)
    y = pixel_shuffle_nhwc(y, r)
    y = _relu6(bn(y, params['bn2']))
    y = bn(_conv_nhwc(y, params['w3'][None, None]), params['bn3'])

    cin, cout = x.shape[-1], y.shape[-1]
    if r != 1 or cin != cout:
        res = _conv_nhwc(x, params['wu'][None, None])
        res = pixel_shuffle_nhwc(res, r)
        res = bn(res, params['bnu'])
    else:
        res = x

    z = jnp.mean(y, axis=(1, 2), keepdims=True)
    hsq = _relu6(jnp.einsum('nhwc,cd->nhwd', z, params['w_se1']))
    s = jax.nn.sigmoid(jnp.einsum('nhwd,dc->nhwc', hsq, params['w_se2']))
    y = _relu6(y * s + res)
    return jnp.transpose(y, (0, 3, 1, 2))


# ---------------------------------------------------------------------------
# Deterministic parameter construction
# ---------------------------------------------------------------------------

def make_params(key, in_channels, channels, expansion, kernel_size, stride, se_r):
    cbn = channels // expansion
    cse = channels // se_r
    r = stride
    ks = jax.random.split(key, 10)

    def wgt(k, shape, fan_in):
        return jax.random.normal(k, shape, jnp.float32) / math.sqrt(fan_in)

    def bn(k, cch):
        k1, k2, k3, k4 = jax.random.split(k, 4)
        gamma = 1.0 + 0.1 * jax.random.normal(k1, (cch,), jnp.float32)
        beta = 0.1 * jax.random.normal(k2, (cch,), jnp.float32)
        mean = 0.1 * jax.random.normal(k3, (cch,), jnp.float32)
        var = 1.0 + 0.2 * jax.random.uniform(k4, (cch,), jnp.float32)
        return gamma, beta, mean, var

    return {
        'w1': wgt(ks[0], (in_channels, cbn), in_channels),
        'bn1': bn(ks[1], cbn),
        'w2': wgt(ks[2], (kernel_size, kernel_size, cbn, cbn * r * r),
                  cbn * kernel_size * kernel_size),
        'bn2': bn(ks[3], cbn),
        'w3': wgt(ks[4], (cbn, channels), cbn),
        'bn3': bn(ks[5], channels),
        'wu': wgt(ks[6], (in_channels, channels * r * r), in_channels),
        'bnu': bn(ks[7], channels),
        'w_se1': wgt(ks[8], (channels, cse), channels),
        'w_se2': wgt(ks[9], (cse, channels), cse),
    }


# ---------------------------------------------------------------------------

if __name__ == "__main__":
    # Config A: typical decoder block (upsamples 2x, changes channel count).
    N, Cin, H, W = 2, 8, 16, 16
    channels, expansion, stride, kernel_size, se_r, dilation = 16, 4, 2, 3, 4, 1

    key = jax.random.PRNGKey(0)
    kx, kp, kx2, kp2 = jax.random.split(key, 4)
    x = jax.random.normal(kx, (N, Cin, H, W), jnp.float32)    # NCHW like PyTorch
    params = make_params(kp, Cin, channels, expansion, kernel_size, stride, se_r)

    ref = jax.block_until_ready(
        reference_forward(x, params, stride=stride, dilation=dilation))

    # Fused kernel, f32 MXU path: tight correctness check of the fused math.
    out_f32 = jax.block_until_ready(jax.jit(functools.partial(
        se_resnet2d_bn_dec_block, stride=stride, dilation=dilation,
        compute_dtype=jnp.float32))(x, params))
    assert out_f32.shape == (N, channels, H * stride, W * stride), out_f32.shape
    np.testing.assert_allclose(np.asarray(out_f32), np.asarray(ref),
                               atol=1e-4, rtol=1e-4)

    # Fused kernel, bf16 MXU path (default / fast path): loose check.
    out_bf16 = jax.block_until_ready(jax.jit(functools.partial(
        se_resnet2d_bn_dec_block, stride=stride, dilation=dilation))(x, params))
    assert out_bf16.shape == out_f32.shape
    np.testing.assert_allclose(np.asarray(out_bf16), np.asarray(ref),
                               atol=1e-1, rtol=1e-1)

    # Config B: identity-residual path (stride 1, in_channels == channels).
    N2, C2, H2, W2 = 2, 16, 8, 8
    x2 = jax.random.normal(kx2, (N2, C2, H2, W2), jnp.float32)
    params2 = make_params(kp2, C2, C2, expansion, kernel_size, 1, se_r)
    ref2 = jax.block_until_ready(
        reference_forward(x2, params2, stride=1, dilation=dilation))
    out2 = jax.block_until_ready(jax.jit(functools.partial(
        se_resnet2d_bn_dec_block, stride=1, dilation=dilation,
        compute_dtype=jnp.float32))(x2, params2))
    np.testing.assert_allclose(np.asarray(out2), np.asarray(ref2),
                               atol=1e-4, rtol=1e-4)

    print("KERNEL_OK")
</pallas_src>

<mosaic_0001>
module attributes {stable_mosaic.version = 11 : i64} {
  func.func @kernel(%arg0: i32, %arg1: memref<1x8x290xf32, #tpu.memory_space<vmem>>, %arg2: memref<9x1x256xf32, #tpu.memory_space<vmem>>, %arg3: memref<4x8xf32, #tpu.memory_space<vmem>>, %arg4: memref<4x1xf32, #tpu.memory_space<vmem>>, %arg5: memref<9x16x4xf32, #tpu.memory_space<vmem>>, %arg6: memref<16x1xf32, #tpu.memory_space<vmem>>, %arg7: memref<64x16xf32, #tpu.memory_space<vmem>>, %arg8: memref<64x1xf32, #tpu.memory_space<vmem>>, %arg9: memref<64x8xf32, #tpu.memory_space<vmem>>, %arg10: memref<64x1xf32, #tpu.memory_space<vmem>>, %arg11: memref<4x64xf32, #tpu.memory_space<vmem>>, %arg12: memref<64x4xf32, #tpu.memory_space<vmem>>, %arg13: memref<1x64x256xf32, #tpu.memory_space<vmem>>) attributes {dimension_semantics = [#tpu.dimension_semantics<parallel>], iteration_bounds = array<i64: 2>, scalar_prefetch = 0 : i64, scratch_operands = 0 : i64, tpu.core_type = #tpu.core_type<tc>, window_params = [{transform_indices = @transform_0, window_bounds = array<i64: 1, 8, 290>}, {pipeline_mode = #tpu.pipeline_mode<synchronous>, transform_indices = @transform_1, window_bounds = array<i64: 9, 1, 256>}, {pipeline_mode = #tpu.pipeline_mode<synchronous>, transform_indices = @transform_2, window_bounds = array<i64: 4, 8>}, {pipeline_mode = #tpu.pipeline_mode<synchronous>, transform_indices = @transform_3, window_bounds = array<i64: 4, 1>}, {pipeline_mode = #tpu.pipeline_mode<synchronous>, transform_indices = @transform_4, window_bounds = array<i64: 9, 16, 4>}, {pipeline_mode = #tpu.pipeline_mode<synchronous>, transform_indices = @transform_5, window_bounds = array<i64: 16, 1>}, {pipeline_mode = #tpu.pipeline_mode<synchronous>, transform_indices = @transform_6, window_bounds = array<i64: 64, 16>}, {pipeline_mode = #tpu.pipeline_mode<synchronous>, transform_indices = @transform_7, window_bounds = array<i64: 64, 1>}, {pipeline_mode = #tpu.pipeline_mode<synchronous>, transform_indices = @transform_8, window_bounds = array<i64: 64, 8>}, {pipeline_mode = #tpu.pipeline_mode<synchronous>, transform_indices = @transform_9, window_bounds = array<i64: 64, 1>}, {pipeline_mode = #tpu.pipeline_mode<synchronous>, transform_indices = @transform_10, window_bounds = array<i64: 4, 64>}, {pipeline_mode = #tpu.pipeline_mode<synchronous>, transform_indices = @transform_11, window_bounds = array<i64: 64, 4>}, {transform_indices = @transform_12, window_bounds = array<i64: 1, 64, 256>}]} {
    %c0 = arith.constant 0 : index
    %c0_0 = arith.constant 0 : index
    %c0_1 = arith.constant 0 : index
    %0 = vector.load %arg1[%c0, %c0_0, %c0_1] : memref<1x8x290xf32, #tpu.memory_space<vmem>>, vector<1x8x290xf32>
    %1 = vector.shape_cast %0 : vector<1x8x290xf32> to vector<8x290xf32>
    %c0_2 = arith.constant 0 : index
    %c0_3 = arith.constant 0 : index
    %2 = vector.load %arg3[%c0_2, %c0_3] : memref<4x8xf32, #tpu.memory_space<vmem>>, vector<4x8xf32>
    %cst = arith.constant dense<0.000000e+00> : vector<4x290xf32>
    %3 = tpu.matmul %2, %1, %cst {dimension_numbers = #tpu.dot_dimension_numbers<[1], [0], [0], [1], [0, 0, 1, 1], [], []>} : vector<4x8xf32>, vector<8x290xf32>, vector<4x290xf32> -> vector<4x290xf32>
    %c0_4 = arith.constant 0 : index
    %c0_5 = arith.constant 0 : index
    %4 = vector.load %arg4[%c0_4, %c0_5] : memref<4x1xf32, #tpu.memory_space<vmem>>, vector<4x1xf32>
    %5 = vector.broadcast %4 : vector<4x1xf32> to vector<4x290xf32>
    %6 = arith.addf %3, %5 : vector<4x290xf32>
    %cst_6 = arith.constant 0.000000e+00 : f32
    %cst_7 = arith.constant 6.000000e+00 : f32
    %7 = vector.broadcast %cst_6 : f32 to vector<4x290xf32>
    %8 = arith.maximumf %7, %6 : vector<4x290xf32>
    %9 = vector.broadcast %cst_7 : f32 to vector<4x290xf32>
    %10 = arith.minimumf %9, %8 : vector<4x290xf32>
    %cst_8 = arith.constant 0.000000e+00 : f32
    %11 = vector.broadcast %cst_8 : f32 to vector<16x256xf32>
    %12 = vector.extract_strided_slice %10 {offsets = [0, 0], sizes = [4, 256], strides = [1, 1]} : vector<4x290xf32> to vector<4x256xf32>
    %c0_9 = arith.constant 0 : index
    %c0_10 = arith.constant 0 : index
    %c0_11 = arith.constant 0 : index
    %13 = vector.load %arg2[%c0_9, %c0_10, %c0_11] : memref<9x1x256xf32, #tpu.memory_space<vmem>>, vector<1x1x256xf32>
    %14 = vector.shape_cast %13 : vector<1x1x256xf32> to vector<1x256xf32>
    %15 = vector.broadcast %14 : vector<1x256xf32> to vector<4x256xf32>
    %16 = arith.mulf %12, %15 : vector<4x256xf32>
    %c0_12 = arith.constant 0 : index
    %c0_13 = arith.constant 0 : index
    %c0_14 = arith.constant 0 : index
    %17 = vector.load %arg5[%c0_12, %c0_13, %c0_14] : memref<9x16x4xf32, #tpu.memory_space<vmem>>, vector<1x16x4xf32>
    %18 = vector.shape_cast %17 : vector<1x16x4xf32> to vector<16x4xf32>
    %cst_15 = arith.constant dense<0.000000e+00> : vector<16x256xf32>
    %19 = tpu.matmul %18, %16, %cst_15 {dimension_numbers = #tpu.dot_dimension_numbers<[1], [0], [0], [1], [0, 0, 1, 1], [], []>} : vector<16x4xf32>, vector<4x256xf32>, vector<16x256xf32> -> vector<16x256xf32>
    %20 = arith.addf %11, %19 : vector<16x256xf32>
    %21 = vector.extract_strided_slice %10 {offsets = [0, 1], sizes = [4, 256], strides = [1, 1]} : vector<4x290xf32> to vector<4x256xf32>
    %c1 = arith.constant 1 : index
    %c0_16 = arith.constant 0 : index
    %c0_17 = arith.constant 0 : index
    %22 = vector.load %arg2[%c1, %c0_16, %c0_17] : memref<9x1x256xf32, #tpu.memory_space<vmem>>, vector<1x1x256xf32>
    %23 = vector.shape_cast %22 : vector<1x1x256xf32> to vector<1x256xf32>
    %24 = vector.broadcast %23 : vector<1x256xf32> to vector<4x256xf32>
    %25 = arith.mulf %21, %24 : vector<4x256xf32>
    %c1_18 = arith.constant 1 : index
    %c0_19 = arith.constant 0 : index
    %c0_20 = arith.constant 0 : index
    %26 = vector.load %arg5[%c1_18, %c0_19, %c0_20] : memref<9x16x4xf32, #tpu.memory_space<vmem>>, vector<1x16x4xf32>
    %27 = vector.shape_cast %26 : vector<1x16x4xf32> to vector<16x4xf32>
    %cst_21 = arith.constant dense<0.000000e+00> : vector<16x256xf32>
    %28 = tpu.matmul %27, %25, %cst_21 {dimension_numbers = #tpu.dot_dimension_numbers<[1], [0], [0], [1], [0, 0, 1, 1], [], []>} : vector<16x4xf32>, vector<4x256xf32>, vector<16x256xf32> -> vector<16x256xf32>
    %29 = arith.addf %20, %28 : vector<16x256xf32>
    %30 = vector.extract_strided_slice %10 {offsets = [0, 2], sizes = [4, 256], strides = [1, 1]} : vector<4x290xf32> to vector<4x256xf32>
    %c2 = arith.constant 2 : index
    %c0_22 = arith.constant 0 : index
    %c0_23 = arith.constant 0 : index
    %31 = vector.load %arg2[%c2, %c0_22, %c0_23] : memref<9x1x256xf32, #tpu.memory_space<vmem>>, vector<1x1x256xf32>
    %32 = vector.shape_cast %31 : vector<1x1x256xf32> to vector<1x256xf32>
    %33 = vector.broadcast %32 : vector<1x256xf32> to vector<4x256xf32>
    %34 = arith.mulf %30, %33 : vector<4x256xf32>
    %c2_24 = arith.constant 2 : index
    %c0_25 = arith.constant 0 : index
    %c0_26 = arith.constant 0 : index
    %35 = vector.load %arg5[%c2_24, %c0_25, %c0_26] : memref<9x16x4xf32, #tpu.memory_space<vmem>>, vector<1x16x4xf32>
    %36 = vector.shape_cast %35 : vector<1x16x4xf32> to vector<16x4xf32>
    %cst_27 = arith.constant dense<0.000000e+00> : vector<16x256xf32>
    %37 = tpu.matmul %36, %34, %cst_27 {dimension_numbers = #tpu.dot_dimension_numbers<[1], [0], [0], [1], [0, 0, 1, 1], [], []>} : vector<16x4xf32>, vector<4x256xf32>, vector<16x256xf32> -> vector<16x256xf32>
    %38 = arith.addf %29, %37 : vector<16x256xf32>
    %39 = vector.extract_strided_slice %10 {offsets = [0, 16], sizes = [4, 256], strides = [1, 1]} : vector<4x290xf32> to vector<4x256xf32>
    %c3 = arith.constant 3 : index
    %c0_28 = arith.constant 0 : index
    %c0_29 = arith.constant 0 : index
    %40 = vector.load %arg2[%c3, %c0_28, %c0_29] : memref<9x1x256xf32, #tpu.memory_space<vmem>>, vector<1x1x256xf32>
    %41 = vector.shape_cast %40 : vector<1x1x256xf32> to vector<1x256xf32>
    %42 = vector.broadcast %41 : vector<1x256xf32> to vector<4x256xf32>
    %43 = arith.mulf %39, %42 : vector<4x256xf32>
    %c3_30 = arith.constant 3 : index
    %c0_31 = arith.constant 0 : index
    %c0_32 = arith.constant 0 : index
    %44 = vector.load %arg5[%c3_30, %c0_31, %c0_32] : memref<9x16x4xf32, #tpu.memory_space<vmem>>, vector<1x16x4xf32>
    %45 = vector.shape_cast %44 : vector<1x16x4xf32> to vector<16x4xf32>
    %cst_33 = arith.constant dense<0.000000e+00> : vector<16x256xf32>
    %46 = tpu.matmul %45, %43, %cst_33 {dimension_numbers = #tpu.dot_dimension_numbers<[1], [0], [0], [1], [0, 0, 1, 1], [], []>} : vector<16x4xf32>, vector<4x256xf32>, vector<16x256xf32> -> vector<16x256xf32>
    %47 = arith.addf %38, %46 : vector<16x256xf32>
    %48 = vector.extract_strided_slice %10 {offsets = [0, 17], sizes = [4, 256], strides = [1, 1]} : vector<4x290xf32> to vector<4x256xf32>
    %c4 = arith.constant 4 : index
    %c0_34 = arith.constant 0 : index
    %c0_35 = arith.constant 0 : index
    %49 = vector.load %arg2[%c4, %c0_34, %c0_35] : memref<9x1x256xf32, #tpu.memory_space<vmem>>, vector<1x1x256xf32>
    %50 = vector.shape_cast %49 : vector<1x1x256xf32> to vector<1x256xf32>
    %51 = vector.broadcast %50 : vector<1x256xf32> to vector<4x256xf32>
    %52 = arith.mulf %48, %51 : vector<4x256xf32>
    %c4_36 = arith.constant 4 : index
    %c0_37 = arith.constant 0 : index
    %c0_38 = arith.constant 0 : index
    %53 = vector.load %arg5[%c4_36, %c0_37, %c0_38] : memref<9x16x4xf32, #tpu.memory_space<vmem>>, vector<1x16x4xf32>
    %54 = vector.shape_cast %53 : vector<1x16x4xf32> to vector<16x4xf32>
    %cst_39 = arith.constant dense<0.000000e+00> : vector<16x256xf32>
    %55 = tpu.matmul %54, %52, %cst_39 {dimension_numbers = #tpu.dot_dimension_numbers<[1], [0], [0], [1], [0, 0, 1, 1], [], []>} : vector<16x4xf32>, vector<4x256xf32>, vector<16x256xf32> -> vector<16x256xf32>
    %56 = arith.addf %47, %55 : vector<16x256xf32>
    %57 = vector.extract_strided_slice %10 {offsets = [0, 18], sizes = [4, 256], strides = [1, 1]} : vector<4x290xf32> to vector<4x256xf32>
    %c5 = arith.constant 5 : index
    %c0_40 = arith.constant 0 : index
    %c0_41 = arith.constant 0 : index
    %58 = vector.load %arg2[%c5, %c0_40, %c0_41] : memref<9x1x256xf32, #tpu.memory_space<vmem>>, vector<1x1x256xf32>
    %59 = vector.shape_cast %58 : vector<1x1x256xf32> to vector<1x256xf32>
    %60 = vector.broadcast %59 : vector<1x256xf32> to vector<4x256xf32>
    %61 = arith.mulf %57, %60 : vector<4x256xf32>
    %c5_42 = arith.constant 5 : index
    %c0_43 = arith.constant 0 : index
    %c0_44 = arith.constant 0 : index
    %62 = vector.load %arg5[%c5_42, %c0_43, %c0_44] : memref<9x16x4xf32, #tpu.memory_space<vmem>>, vector<1x16x4xf32>
    %63 = vector.shape_cast %62 : vector<1x16x4xf32> to vector<16x4xf32>
    %cst_45 = arith.constant dense<0.000000e+00> : vector<16x256xf32>
    %64 = tpu.matmul %63, %61, %cst_45 {dimension_numbers = #tpu.dot_dimension_numbers<[1], [0], [0], [1], [0, 0, 1, 1], [], []>} : vector<16x4xf32>, vector<4x256xf32>, vector<16x256xf32> -> vector<16x256xf32>
    %65 = arith.addf %56, %64 : vector<16x256xf32>
    %66 = vector.extract_strided_slice %10 {offsets = [0, 32], sizes = [4, 256], strides = [1, 1]} : vector<4x290xf32> to vector<4x256xf32>
    %c6 = arith.constant 6 : index
    %c0_46 = arith.constant 0 : index
    %c0_47 = arith.constant 0 : index
    %67 = vector.load %arg2[%c6, %c0_46, %c0_47] : memref<9x1x256xf32, #tpu.memory_space<vmem>>, vector<1x1x256xf32>
    %68 = vector.shape_cast %67 : vector<1x1x256xf32> to vector<1x256xf32>
    %69 = vector.broadcast %68 : vector<1x256xf32> to vector<4x256xf32>
    %70 = arith.mulf %66, %69 : vector<4x256xf32>
    %c6_48 = arith.constant 6 : index
    %c0_49 = arith.constant 0 : index
    %c0_50 = arith.constant 0 : index
    %71 = vector.load %arg5[%c6_48, %c0_49, %c0_50] : memref<9x16x4xf32, #tpu.memory_space<vmem>>, vector<1x16x4xf32>
    %72 = vector.shape_cast %71 : vector<1x16x4xf32> to vector<16x4xf32>
    %cst_51 = arith.constant dense<0.000000e+00> : vector<16x256xf32>
    %73 = tpu.matmul %72, %70, %cst_51 {dimension_numbers = #tpu.dot_dimension_numbers<[1], [0], [0], [1], [0, 0, 1, 1], [], []>} : vector<16x4xf32>, vector<4x256xf32>, vector<16x256xf32> -> vector<16x256xf32>
    %74 = arith.addf %65, %73 : vector<16x256xf32>
    %75 = vector.extract_strided_slice %10 {offsets = [0, 33], sizes = [4, 256], strides = [1, 1]} : vector<4x290xf32> to vector<4x256xf32>
    %c7 = arith.constant 7 : index
    %c0_52 = arith.constant 0 : index
    %c0_53 = arith.constant 0 : index
    %76 = vector.load %arg2[%c7, %c0_52, %c0_53] : memref<9x1x256xf32, #tpu.memory_space<vmem>>, vector<1x1x256xf32>
    %77 = vector.shape_cast %76 : vector<1x1x256xf32> to vector<1x256xf32>
    %78 = vector.broadcast %77 : vector<1x256xf32> to vector<4x256xf32>
    %79 = arith.mulf %75, %78 : vector<4x256xf32>
    %c7_54 = arith.constant 7 : index
    %c0_55 = arith.constant 0 : index
    %c0_56 = arith.constant 0 : index
    %80 = vector.load %arg5[%c7_54, %c0_55, %c0_56] : memref<9x16x4xf32, #tpu.memory_space<vmem>>, vector<1x16x4xf32>
    %81 = vector.shape_cast %80 : vector<1x16x4xf32> to vector<16x4xf32>
    %cst_57 = arith.constant dense<0.000000e+00> : vector<16x256xf32>
    %82 = tpu.matmul %81, %79, %cst_57 {dimension_numbers = #tpu.dot_dimension_numbers<[1], [0], [0], [1], [0, 0, 1, 1], [], []>} : vector<16x4xf32>, vector<4x256xf32>, vector<16x256xf32> -> vector<16x256xf32>
    %83 = arith.addf %74, %82 : vector<16x256xf32>
    %84 = vector.extract_strided_slice %10 {offsets = [0, 34], sizes = [4, 256], strides = [1, 1]} : vector<4x290xf32> to vector<4x256xf32>
    %c8 = arith.constant 8 : index
    %c0_58 = arith.constant 0 : index
    %c0_59 = arith.constant 0 : index
    %85 = vector.load %arg2[%c8, %c0_58, %c0_59] : memref<9x1x256xf32, #tpu.memory_space<vmem>>, vector<1x1x256xf32>
    %86 = vector.shape_cast %85 : vector<1x1x256xf32> to vector<1x256xf32>
    %87 = vector.broadcast %86 : vector<1x256xf32> to vector<4x256xf32>
    %88 = arith.mulf %84, %87 : vector<4x256xf32>
    %c8_60 = arith.constant 8 : index
    %c0_61 = arith.constant 0 : index
    %c0_62 = arith.constant 0 : index
    %89 = vector.load %arg5[%c8_60, %c0_61, %c0_62] : memref<9x16x4xf32, #tpu.memory_space<vmem>>, vector<1x16x4xf32>
    %90 = vector.shape_cast %89 : vector<1x16x4xf32> to vector<16x4xf32>
    %cst_63 = arith.constant dense<0.000000e+00> : vector<16x256xf32>
    %91 = tpu.matmul %90, %88, %cst_63 {dimension_numbers = #tpu.dot_dimension_numbers<[1], [0], [0], [1], [0, 0, 1, 1], [], []>} : vector<16x4xf32>, vector<4x256xf32>, vector<16x256xf32> -> vector<16x256xf32>
    %92 = arith.addf %83, %91 : vector<16x256xf32>
    %c0_64 = arith.constant 0 : index
    %c0_65 = arith.constant 0 : index
    %93 = vector.load %arg6[%c0_64, %c0_65] : memref<16x1xf32, #tpu.memory_space<vmem>>, vector<16x1xf32>
    %94 = vector.broadcast %93 : vector<16x1xf32> to vector<16x256xf32>
    %95 = arith.addf %92, %94 : vector<16x256xf32>
    %cst_66 = arith.constant 0.000000e+00 : f32
    %cst_67 = arith.constant 6.000000e+00 : f32
    %96 = vector.broadcast %cst_66 : f32 to vector<16x256xf32>
    %97 = arith.maximumf %96, %95 : vector<16x256xf32>
    %98 = vector.broadcast %cst_67 : f32 to vector<16x256xf32>
    %99 = arith.minimumf %98, %97 : vector<16x256xf32>
    %c0_68 = arith.constant 0 : index
    %c0_69 = arith.constant 0 : index
    %100 = vector.load %arg7[%c0_68, %c0_69] : memref<64x16xf32, #tpu.memory_space<vmem>>, vector<64x16xf32>
    %cst_70 = arith.constant dense<0.000000e+00> : vector<64x256xf32>
    %101 = tpu.matmul %100, %99, %cst_70 {dimension_numbers = #tpu.dot_dimension_numbers<[1], [0], [0], [1], [0, 0, 1, 1], [], []>} : vector<64x16xf32>, vector<16x256xf32>, vector<64x256xf32> -> vector<64x256xf32>
    %c0_71 = arith.constant 0 : index
    %c0_72 = arith.constant 0 : index
    %102 = vector.load %arg8[%c0_71, %c0_72] : memref<64x1xf32, #tpu.memory_space<vmem>>, vector<64x1xf32>
    %103 = vector.broadcast %102 : vector<64x1xf32> to vector<64x256xf32>
    %104 = arith.addf %101, %103 : vector<64x256xf32>
    %105 = vector.extract_strided_slice %1 {offsets = [0, 17], sizes = [8, 256], strides = [1, 1]} : vector<8x290xf32> to vector<8x256xf32>
    %c0_73 = arith.constant 0 : index
    %c0_74 = arith.constant 0 : index
    %106 = vector.load %arg9[%c0_73, %c0_74] : memref<64x8xf32, #tpu.memory_space<vmem>>, vector<64x8xf32>
    %cst_75 = arith.constant dense<0.000000e+00> : vector<64x256xf32>
    %107 = tpu.matmul %106, %105, %cst_75 {dimension_numbers = #tpu.dot_dimension_numbers<[1], [0], [0], [1], [0, 0, 1, 1], [], []>} : vector<64x8xf32>, vector<8x256xf32>, vector<64x256xf32> -> vector<64x256xf32>
    %c0_76 = arith.constant 0 : index
    %c0_77 = arith.constant 0 : index
    %108 = vector.load %arg10[%c0_76, %c0_77] : memref<64x1xf32, #tpu.memory_space<vmem>>, vector<64x1xf32>
    %109 = vector.broadcast %108 : vector<64x1xf32> to vector<64x256xf32>
    %110 = arith.addf %107, %109 : vector<64x256xf32>
    %c0_78 = arith.constant 0 : index
    %c0_79 = arith.constant 0 : index
    %111 = vector.load %arg11[%c0_78, %c0_79] : memref<4x64xf32, #tpu.memory_space<vmem>>, vector<4x64xf32>
    %cst_80 = arith.constant dense<0.000000e+00> : vector<4x256xf32>
    %112 = tpu.matmul %111, %104, %cst_80 {dimension_numbers = #tpu.dot_dimension_numbers<[1], [0], [0], [1], [0, 0, 1, 1], [], []>} : vector<4x64xf32>, vector<64x256xf32>, vector<4x256xf32> -> vector<4x256xf32>
    %cst_81 = arith.constant dense<0.000000e+00> : vector<4xf32>
    %113 = vector.multi_reduction <add>, %112, %cst_81 [1] : vector<4x256xf32> to vector<4xf32>
    %114 = vector.shape_cast %113 : vector<4xf32> to vector<4x1xf32>
    %cst_82 = arith.constant 2.560000e+02 : f32
    %115 = vector.broadcast %cst_82 : f32 to vector<4x1xf32>
    %116 = arith.divf %114, %115 : vector<4x1xf32>
    %cst_83 = arith.constant 0.000000e+00 : f32
    %cst_84 = arith.constant 6.000000e+00 : f32
    %117 = vector.broadcast %cst_83 : f32 to vector<4x1xf32>
    %118 = arith.maximumf %117, %116 : vector<4x1xf32>
    %119 = vector.broadcast %cst_84 : f32 to vector<4x1xf32>
    %120 = arith.minimumf %119, %118 : vector<4x1xf32>
    %c0_85 = arith.constant 0 : index
    %c0_86 = arith.constant 0 : index
    %121 = vector.load %arg12[%c0_85, %c0_86] : memref<64x4xf32, #tpu.memory_space<vmem>>, vector<64x4xf32>
    %cst_87 = arith.constant 0.000000e+00 : f32
    %122 = vector.broadcast %cst_87 : f32 to vector<64x1xf32>
    %123 = vector.extract_strided_slice %121 {offsets = [0, 0], sizes = [64, 1], strides = [1, 1]} : vector<64x4xf32> to vector<64x1xf32>
    %124 = vector.extract_strided_slice %120 {offsets = [0, 0], sizes = [1, 1], strides = [1, 1]} : vector<4x1xf32> to vector<1x1xf32>
    %125 = vector.broadcast %124 : vector<1x1xf32> to vector<64x1xf32>
    %126 = arith.mulf %123, %125 : vector<64x1xf32>
    %127 = arith.addf %122, %126 : vector<64x1xf32>
    %128 = vector.extract_strided_slice %121 {offsets = [0, 1], sizes = [64, 1], strides = [1, 1]} : vector<64x4xf32> to vector<64x1xf32>
    %129 = vector.extract_strided_slice %120 {offsets = [1, 0], sizes = [1, 1], strides = [1, 1]} : vector<4x1xf32> to vector<1x1xf32>
    %130 = vector.broadcast %129 : vector<1x1xf32> to vector<64x1xf32>
    %131 = arith.mulf %128, %130 : vector<64x1xf32>
    %132 = arith.addf %127, %131 : vector<64x1xf32>
    %133 = vector.extract_strided_slice %121 {offsets = [0, 2], sizes = [64, 1], strides = [1, 1]} : vector<64x4xf32> to vector<64x1xf32>
    %134 = vector.extract_strided_slice %120 {offsets = [2, 0], sizes = [1, 1], strides = [1, 1]} : vector<4x1xf32> to vector<1x1xf32>
    %135 = vector.broadcast %134 : vector<1x1xf32> to vector<64x1xf32>
    %136 = arith.mulf %133, %135 : vector<64x1xf32>
    %137 = arith.addf %132, %136 : vector<64x1xf32>
    %138 = vector.extract_strided_slice %121 {offsets = [0, 3], sizes = [64, 1], strides = [1, 1]} : vector<64x4xf32> to vector<64x1xf32>
    %139 = vector.extract_strided_slice %120 {offsets = [3, 0], sizes = [1, 1], strides = [1, 1]} : vector<4x1xf32> to vector<1x1xf32>
    %140 = vector.broadcast %139 : vector<1x1xf32> to vector<64x1xf32>
    %141 = arith.mulf %138, %140 : vector<64x1xf32>
    %142 = arith.addf %137, %141 : vector<64x1xf32>
    %143 = arith.negf %142 : vector<64x1xf32>
    %144 = math.exp %143 : vector<64x1xf32>
    %cst_88 = arith.constant 1.000000e+00 : f32
    %145 = vector.broadcast %cst_88 : f32 to vector<64x1xf32>
    %146 = arith.addf %145, %144 : vector<64x1xf32>
    %147 = arith.divf %145, %146 : vector<64x1xf32>
    %148 = vector.broadcast %147 : vector<64x1xf32> to vector<64x256xf32>
    %149 = arith.mulf %104, %148 : vector<64x256xf32>
    %150 = arith.addf %149, %110 : vector<64x256xf32>
    %cst_89 = arith.constant 0.000000e+00 : f32
    %cst_90 = arith.constant 6.000000e+00 : f32
    %151 = vector.broadcast %cst_89 : f32 to vector<64x256xf32>
    %152 = arith.maximumf %151, %150 : vector<64x256xf32>
    %153 = vector.broadcast %cst_90 : f32 to vector<64x256xf32>
    %154 = arith.minimumf %153, %152 : vector<64x256xf32>
    %155 = vector.shape_cast %154 : vector<64x256xf32> to vector<1x64x256xf32>
    %c0_91 = arith.constant 0 : index
    %c0_92 = arith.constant 0 : index
    %c0_93 = arith.constant 0 : index
    %156 = vector.load %arg13[%c0_91, %c0_92, %c0_93] : memref<1x64x256xf32, #tpu.memory_space<vmem>>, vector<1x64x256xf32>
    tpu.vector_store %arg13[%c0_91, %c0_92, %c0_93], %155 {strides = array<i32>} : memref<1x64x256xf32, #tpu.memory_space<vmem>>, vector<1x64x256xf32>,
    return
  }
  func.func @transform_0(%arg0: i32) -> (i32, i32, i32) {
    %c0_i32 = arith.constant 0 : i32
    %c0_i32_0 = arith.constant 0 : i32
    %c0_i32_1 = arith.constant 0 : i32
    return %arg0, %c0_i32, %c0_i32_0 : i32, i32, i32
  }
  func.func @transform_1(%arg0: i32) -> (i32, i32, i32) {
    %c0_i32 = arith.constant 0 : i32
    %c0_i32_0 = arith.constant 0 : i32
    %c0_i32_1 = arith.constant 0 : i32
    %c0_i32_2 = arith.constant 0 : i32
    return %c0_i32, %c0_i32_0, %c0_i32_1 : i32, i32, i32
  }
  func.func @transform_2(%arg0: i32) -> (i32, i32) {
    %c0_i32 = arith.constant 0 : i32
    %c0_i32_0 = arith.constant 0 : i32
    %c0_i32_1 = arith.constant 0 : i32
    return %c0_i32, %c0_i32_0 : i32, i32
  }
  func.func @transform_3(%arg0: i32) -> (i32, i32) {
    %c0_i32 = arith.constant 0 : i32
    %c0_i32_0 = arith.constant 0 : i32
    %c0_i32_1 = arith.constant 0 : i32
    return %c0_i32, %c0_i32_0 : i32, i32
  }
  func.func @transform_4(%arg0: i32) -> (i32, i32, i32) {
    %c0_i32 = arith.constant 0 : i32
    %c0_i32_0 = arith.constant 0 : i32
    %c0_i32_1 = arith.constant 0 : i32
    %c0_i32_2 = arith.constant 0 : i32
    return %c0_i32, %c0_i32_0, %c0_i32_1 : i32, i32, i32
  }
  func.func @transform_5(%arg0: i32) -> (i32, i32) {
    %c0_i32 = arith.constant 0 : i32
    %c0_i32_0 = arith.constant 0 : i32
    %c0_i32_1 = arith.constant 0 : i32
    return %c0_i32, %c0_i32_0 : i32, i32
  }
  func.func @transform_6(%arg0: i32) -> (i32, i32) {
    %c0_i32 = arith.constant 0 : i32
    %c0_i32_0 = arith.constant 0 : i32
    %c0_i32_1 = arith.constant 0 : i32
    return %c0_i32, %c0_i32_0 : i32, i32
  }
  func.func @transform_7(%arg0: i32) -> (i32, i32) {
    %c0_i32 = arith.constant 0 : i32
    %c0_i32_0 = arith.constant 0 : i32
    %c0_i32_1 = arith.constant 0 : i32
    return %c0_i32, %c0_i32_0 : i32, i32
  }
  func.func @transform_8(%arg0: i32) -> (i32, i32) {
    %c0_i32 = arith.constant 0 : i32
    %c0_i32_0 = arith.constant 0 : i32
    %c0_i32_1 = arith.constant 0 : i32
    return %c0_i32, %c0_i32_0 : i32, i32
  }
  func.func @transform_9(%arg0: i32) -> (i32, i32) {
    %c0_i32 = arith.constant 0 : i32
    %c0_i32_0 = arith.constant 0 : i32
    %c0_i32_1 = arith.constant 0 : i32
    return %c0_i32, %c0_i32_0 : i32, i32
  }
  func.func @transform_10(%arg0: i32) -> (i32, i32) {
    %c0_i32 = arith.constant 0 : i32
    %c0_i32_0 = arith.constant 0 : i32
    %c0_i32_1 = arith.constant 0 : i32
    return %c0_i32, %c0_i32_0 : i32, i32
  }
  func.func @transform_11(%arg0: i32) -> (i32, i32) {
    %c0_i32 = arith.constant 0 : i32
    %c0_i32_0 = arith.constant 0 : i32
    %c0_i32_1 = arith.constant 0 : i32
    return %c0_i32, %c0_i32_0 : i32, i32
  }
  func.func @transform_12(%arg0: i32) -> (i32, i32, i32) {
    %c0_i32 = arith.constant 0 : i32
    %c0_i32_0 = arith.constant 0 : i32
    %c0_i32_1 = arith.constant 0 : i32
    return %arg0, %c0_i32, %c0_i32_0 : i32, i32, i32
  }
}

</mosaic_0001>

<bundles_post_ra>
// kernel: mul.28
= control target key start
LH: loop header
LB: loop body
LE: loop exit
PB: predicated region body
PF: predicated region fallthrough
CT: control target
= control target key end

     0   :  { %vm7_vm0 = vcmask 31744   ;;  %s37_s8 = smov 4   ;;  %s38_s9 = smov 8   ;;  %vm13_vm1 = vcmask 130144   ;;  %vm19_vm2 = vcmask 97344   ;;  %vm25_vm3 = vcmask 64544   ;;  %s55_s0 = inlined_call_operand.vmem [shape: f32[4,4], index: 0, kind: input, shape index: {}]   ;;  %s56_s1 = inlined_call_operand.vmem [shape: f32[16], index: 1, kind: output, shape index: {}]  }
   0x1   :  { %v4_v0 = vld [vmem:[%s55_s0] sm:$0xf]  ;;  %s36_s0 = smov 12  }
   0x2   :  { %5 = vst [vmem:[#allocation1] sm:$0xf] %v4_v0 }
   0x9   :  { %v10_v1 = vld [vmem:[#allocation1 + $0x3] sm:$0x1]   ;;  %v22_v2 = vld [vmem:[#allocation1 + $0x1] sm:$0x1]   ;;  %v6_v3 = vld [vmem:[#allocation1] sm:$0x1]  }
   0xa   :  { %11 = vrot.lane.b32.xlu0 %v10_v1, %s36_s0  ;;  %23 = vrot.lane.b32.xlu1 %v22_v2, %s37_s8  ;;  %v16_v4 = vld [vmem:[#allocation1 + $0x2] sm:$0x1]   ;;  %8 = vst.msk [vmem:[#allocation0] sm:$0x1] %vm7_vm0, %v6_v3  }
   0xe   :  { %17 = vrot.lane.b32.xlu0 %v16_v4, %s38_s9 }
  0x7c   :  { %v12_v5 = vpop.permute.xlu0 %11   ;;  %v24_v6 = vpop.permute.xlu1 %23  }
  0x7d   :  { %14 = vst.msk [vmem:[#allocation0] sm:$0x1] %vm13_vm1, %v12_v5  }
  0x80   :  { %v18_v7 = vpop.permute.xlu0 %17  }
  0x81   :  { %20 = vst.msk [vmem:[#allocation0] sm:$0x1] %vm19_vm2, %v18_v7  }
  0x82   :  { %26 = vst.msk [vmem:[#allocation0] sm:$0x1] %vm25_vm3, %v24_v6  }
  0x89   :  { %v30_v8 = vld [vmem:[#allocation0] sm:$0x1] }
  0x8a   :  { %32 = vst [vmem:[%s56_s1] sm:$0x1] %v30_v8 }

// kernel: mul.37
= control target key start
LH: loop header
LB: loop body
LE: loop exit
PB: predicated region body
PF: predicated region fallthrough
CT: control target
= control target key end

     0   :  { %s131_s10 = smov 60   ;;  %s132_s11 = smov 52   ;;  %vm3_vm0 = vcmask 31744   ;;  %vm9_vm1 = vcmask 523744   ;;  %vm15_vm2 = vcmask 490944   ;;  %vm21_vm3 = vcmask 458144   ;;  %s207_s0 = inlined_call_operand.vmem [shape: f32[16,4], index: 0, kind: input, shape index: {}]   ;;  %s208_s1 = inlined_call_operand.vmem [shape: f32[64], index: 1, kind: output, shape index: {}]  }
   0x1   :  { %v101_v0 = vld [vmem:[%s207_s0 + $0xf] sm:$0x1]   ;;  %v103_v1 = vld [vmem:[%s207_s0 + $0xd] sm:$0x1]   ;;  %v102_v2 = vld [vmem:[%s207_s0 + $0xe] sm:$0x1]  }
   0x2   :  { %7 = vrot.lane.b32.xlu0 %v101_v0, %s131_s10  ;;  %19 = vrot.lane.b32.xlu1 %v103_v1, %s132_s11  ;;  %v104_v3 = vld [vmem:[%s207_s0 + $0xc] sm:$0x1]   ;;  %s133_s16 = smov 56   ;;  %s134_s17 = smov 48   ;;  %v105_v4 = vld [vmem:[%s207_s0 + $0xb] sm:$0x1]  }
   0x3   :  { %v106_v5 = vld [vmem:[%s207_s0 + $0xa] sm:$0x1]   ;;  %v2_v6 = vld [vmem:[%s207_s0] sm:$0x1]   ;;  %s135_s24 = smov 44   ;;  %s136_s25 = smov 40  }
   0x4   :  { %4 = vst.msk [vmem:[#allocation0] sm:$0x1] %vm3_vm0, %v2_v6   ;;  %v107_v7 = vld [vmem:[%s207_s0 + $0x9] sm:$0x1]   ;;  %v108_v8 = vld [vmem:[%s207_s0 + $0x8] sm:$0x1]  }
   0x5   :  { %s137_s30 = smov 36   ;;  %s138_s2 = smov 32   ;;  %v109_v9 = vld [vmem:[%s207_s0 + $0x7] sm:$0x1]   ;;  %v110_v10 = vld [vmem:[%s207_s0 + $0x6] sm:$0x1]  }
   0x6   :  { %13 = vrot.lane.b32.xlu0 %v102_v2, %s133_s16  ;;  %25 = vrot.lane.b32.xlu1 %v104_v3, %s134_s17  ;;  %s139_s7 = smov 28   ;;  %s140_s8 = smov 24   ;;  %v111_v11 = vld [vmem:[%s207_s0 + $0x5] sm:$0x1]   ;;  %v112_v12 = vld [vmem:[%s207_s0 + $0x4] sm:$0x1]  }
   0x7   :  { %s141_s13 = smov 20   ;;  %s142_s14 = smov 16   ;;  %v113_v13 = vld [vmem:[%s207_s0 + $0x3] sm:$0x1]   ;;  %v114_v14 = vld [vmem:[%s207_s0 + $0x2] sm:$0x1]  }
   0x8   :  { %s143_s19 = smov 12   ;;  %s144_s20 = smov 8   ;;  %v115_v15 = vld [vmem:[%s207_s0 + $0x1] sm:$0x1]   ;;  %vm27_vm4 = vcmask 425344   ;;  %vm33_vm5 = vcmask 392544  }
   0x9   :  { %s145_s0 = smov 4   ;;  %vm39_vm6 = vcmask 359744   ;;  %vm45_vm7 = vcmask 326944   ;;  %vm51_vm8 = vcmask 294144   ;;  %vm57_vm9 = vcmask 261344  }
   0xa   :  { %31 = vrot.lane.b32.xlu0 %v105_v4, %s135_s24  ;;  %37 = vrot.lane.b32.xlu1 %v106_v5, %s136_s25  ;;  %vm63_vm10 = vcmask 228544   ;;  %vm69_vm11 = vcmask 195744   ;;  %vm75_vm12 = vcmask 162944   ;;  %vm81_vm13 = vcmask 130144  }
   0xb   :  { %vm87_vm14 = vcmask 97344   ;;  %vm93_vm15 = vcmask 64544  }
   0xe   :  { %43 = vrot.lane.b32.xlu0 %v107_v7, %s137_s30  ;;  %49 = vrot.lane.b32.xlu1 %v108_v8, %s138_s2 }
  0x12   :  { %55 = vrot.lane.b32.xlu0 %v109_v9, %s139_s7  ;;  %61 = vrot.lane.b32.xlu1 %v110_v10, %s140_s8 }
  0x16   :  { %67 = vrot.lane.b32.xlu0 %v111_v11, %s141_s13  ;;  %73 = vrot.lane.b32.xlu1 %v112_v12, %s142_s14 }
  0x1a   :  { %79 = vrot.lane.b32.xlu0 %v113_v13, %s143_s19  ;;  %85 = vrot.lane.b32.xlu1 %v114_v14, %s144_s20 }
  0x1e   :  { %91 = vrot.lane.b32.xlu0 %v115_v15, %s145_s0 }
  0x74   :  { %v8_v16 = vpop.permute.xlu0 %7   ;;  %v20_v17 = vpop.permute.xlu1 %19  }
  0x75   :  { %10 = vst.msk [vmem:[#allocation0] sm:$0x1] %vm9_vm1, %v8_v16  }
  0x78   :  { %v14_v18 = vpop.permute.xlu0 %13   ;;  %v26_v19 = vpop.permute.xlu1 %25  }
  0x79   :  { %16 = vst.msk [vmem:[#allocation0] sm:$0x1] %vm15_vm2, %v14_v18  }
  0x7a   :  { %22 = vst.msk [vmem:[#allocation0] sm:$0x1] %vm21_vm3, %v20_v17  }
  0x7b   :  { %28 = vst.msk [vmem:[#allocation0] sm:$0x1] %vm27_vm4, %v26_v19  }
  0x7c   :  { %v32_v20 = vpop.permute.xlu0 %31   ;;  %v38_v21 = vpop.permute.xlu1 %37  }
  0x7d   :  { %34 = vst.msk [vmem:[#allocation0] sm:$0x1] %vm33_vm5, %v32_v20  }
  0x7e   :  { %40 = vst.msk [vmem:[#allocation0] sm:$0x1] %vm39_vm6, %v38_v21  }
  0x80   :  { %v44_v22 = vpop.permute.xlu0 %43   ;;  %v50_v23 = vpop.permute.xlu1 %49  }
  0x81   :  { %46 = vst.msk [vmem:[#allocation0] sm:$0x1] %vm45_vm7, %v44_v22  }
  0x82   :  { %52 = vst.msk [vmem:[#allocation0] sm:$0x1] %vm51_vm8, %v50_v23  }
  0x84   :  { %v56_v24 = vpop.permute.xlu0 %55   ;;  %v62_v25 = vpop.permute.xlu1 %61  }
  0x85   :  { %58 = vst.msk [vmem:[#allocation0] sm:$0x1] %vm57_vm9, %v56_v24  }
  0x86   :  { %64 = vst.msk [vmem:[#allocation0] sm:$0x1] %vm63_vm10, %v62_v25  }
  0x88   :  { %v68_v26 = vpop.permute.xlu0 %67   ;;  %v74_v27 = vpop.permute.xlu1 %73  }
  0x89   :  { %70 = vst.msk [vmem:[#allocation0] sm:$0x1] %vm69_vm11, %v68_v26  }
  0x8a   :  { %76 = vst.msk [vmem:[#allocation0] sm:$0x1] %vm75_vm12, %v74_v27  }
  0x8c   :  { %v80_v28 = vpop.permute.xlu0 %79   ;;  %v86_v29 = vpop.permute.xlu1 %85  }
  0x8d   :  { %82 = vst.msk [vmem:[#allocation0] sm:$0x1] %vm81_vm13, %v80_v28  }
  0x8e   :  { %88 = vst.msk [vmem:[#allocation0] sm:$0x1] %vm87_vm14, %v86_v29  }
  0x90   :  { %v92_v30 = vpop.permute.xlu0 %91  }
  0x91   :  { %94 = vst.msk [vmem:[#allocation0] sm:$0x1] %vm93_vm15, %v92_v30  }
  0x98   :  { %v98_v31 = vld [vmem:[#allocation0] sm:$0x1] }
  0x99   :  { %100 = vst [vmem:[%s208_s1] sm:$0x1] %v98_v31 }

// kernel: se_resnet2d_bn_dec_block.1
= control target key start
LH: loop header
LB: loop body
LE: loop exit
PB: predicated region body
PF: predicated region fallthrough
CT: control target
= control target key end

     0   :  { %s2938_s21 = smov 0   ;;  %s3572_s0 = inlined_call_operand.vmem [shape: f32[2,8,290], index: 0, kind: input, shape index: {}]   ;;  %s3573_s1 = inlined_call_operand.vmem [shape: f32[9,1,256], index: 1, kind: input, shape index: {}]   ;;  %s3574_s2 = inlined_call_operand.vmem [shape: f32[4,8], index: 2, kind: input, shape index: {}]   ;;  %s3575_s3 = inlined_call_operand.vmem [shape: f32[4,1], index: 3, kind: input, shape index: {}]   ;;  %s3576_s4 = inlined_call_operand.vmem [shape: f32[9,16,4], index: 4, kind: input, shape index: {}]   ;;  %s3577_s5 = inlined_call_operand.vmem [shape: f32[16,1], index: 5, kind: input, shape index: {}]   ;;  %s3578_s6 = inlined_call_operand.vmem [shape: f32[64,16], index: 6, kind: input, shape index: {}]   ;;  %s3579_s7 = inlined_call_operand.vmem [shape: f32[64,1], index: 7, kind: input, shape index: {}]   ;;  %s3580_s8 = inlined_call_operand.vmem [shape: f32[64,8], index: 8, kind: input, shape index: {}]   ;;  %s3581_s9 = inlined_call_operand.vmem [shape: f32[64,1], index: 9, kind: input, shape index: {}]   ;;  %s3582_s10 = inlined_call_operand.vmem [shape: f32[4,64], index: 10, kind: input, shape index: {}]   ;;  %s3583_s11 = inlined_call_operand.vmem [shape: f32[64,4], index: 11, kind: input, shape index: {}]   ;;  %s3584_s12 = inlined_call_operand.vmem [shape: f32[2,64,256], index: 12, kind: output, shape index: {}]  }
   0x1 LB: > { %s2625_s22 = sadd.s32 4294967295, %s2851_s21   ;;  %p2629_p0 = scmp.ge.s32.totalorder %s2851_s21, 1  ;;  %s2851_s21 = sphi %s2938_s21, %s22_s21  }
   0x2   : > { %p362_p1 = scmp.lt.s32.totalorder %s2851_s21, 3 }
   0x4   : > { %p363_p2 = pnand %p2629_p0, %p362_p1 }
   0x6   : > { %366 = sbr.rel (%p363_p2) target bundleno = 1683 (0x693), region = 68 }
   0xd   : > { %p404_p3 = scmp.lt.s32.totalorder %s2625_s22, 1  ;;  %v577_v0 = vlaneseq  ;;  %v2853_v1 = vmov 0.0   ;;  %vm2854_vm0 = vmmov 0   ;;  %v418_v2 = vld [vmem:[%s3575_s3] sm:$0xf]  ;;  %v2855_v3 = vmov 0  }
   0xe   : > { %2725 = vmatprep.subr.mxu1 %v2853_v1  ;;  %2727 = vmatprep.mubr.msk.f32.mxu1 %vm2854_vm0, %v2853_v1  ;;  %v2635_v5 = vld [vmem:[%s3573_s1 + $0x2] sm:$0x3]  ;;  %vm424_vm1 = vcmask 64512   ;;  %v2646_v10 = vld [vmem:[%s3573_s1 + $0x4] sm:$0x3]  ;;  %s2856_s17 = smov 1  }
   0xf   : > { %s3596_s22 = smov (!%p404_p3, %s2625_s22), 1  ;;  %492 = vmatprep.mubr.f32.mxu0 %v2853_v1  ;;  %2811 = vset.pattern.permute.xlu0 %v2855_v3  ;;  %v2954_v4 = vshrl.u32 %v577_v0, 7  ;;  %v417_v8 = vld [vmem:[%s3574_s2] sm:$0xf]  ;;  %v2653_v17 = vld [vmem:[%s3573_s1 + $0x6] sm:$0x3] }
  0x10   : > { %421 = vperm.xlu0 %2811, %v418_v2   ;;  %2812 = vset.pattern.permute.xlu1 %v2855_v3  ;;  %s2782_s27 = smul.u32 24, %s3596_s22  ;;  %s2857_s20 = smov 2   ;;  %v2660_v20 = vld [vmem:[%s3573_s1 + $0x8] sm:$0x3]  ;;  %v2667_v23 = vld [vmem:[%s3573_s1 + $0xa] sm:$0x3] }
  0x11   : > { %v2961_v6 = vsub.s32 1, %v2954_v4  ;;  %v2964_v7 = vsub.s32 0, %v2954_v4  ;;  %s2858_s25 = smov 16   ;;  %s2859_s28 = smov 17   ;;  %v2674_v26 = vld [vmem:[%s3573_s1 + $0xc] sm:$0x3] }
  0x12   : > { %s408_s30 = scalar_lea.vmem %s3572_s0, %s2782_s27  ;;  %s2860_s13 = smov 18   ;;  %v2681_v29 = vld [vmem:[%s3573_s1 + $0xe] sm:$0x3]  ;;  %vm606_vm2 = vcmask 7168   ;;  %v2688_v47 = vld [vmem:[%s3573_s1 + $0x10] sm:$0x3] }
  0x13   : > { %v601_v9 = vrot.slane %v2635_v5, %v2961_v6  ;;  %v2976_v11 = vld [vmem:[%s408_s30 + $0x8] sm:$0xff]  ;;  %v2978_v12 = vld [vmem:[%s408_s30 + $0x10] sm:$0xff]  ;;  %v2980_v13 = vld [vmem:[%s408_s30] sm:$0xff]  ;;  %v597_v14 = vrot.slane %v2635_v5, %v2964_v7  ;;  %v813_v15 = vrot.slane %v2646_v10, %v2964_v7  ;;  %v817_v16 = vrot.slane %v2646_v10, %v2961_v6  ;;  %s2861_s16 = smov 32   ;;  %s2864_s23 = smov 34  }
  0x14   : > { %428 = vmatprep.subr.mxu0 %v2976_v11  ;;  %2726 = vmatpush3.msra.mxu1 %v2978_v12  ;;  %v942_v18 = vrot.slane %v2653_v17, %v2964_v7  ;;  %v946_v19 = vrot.slane %v2653_v17, %v2961_v6  ;;  %v1071_v21 = vrot.slane %v2660_v20, %v2964_v7  ;;  %vm822_vm3 = vcmask 15360   ;;  %s2865_s24 = smov 126   ;;  %s2867_s26 = smov 111  }
  0x15   : > { %429 = vmatpush1.msra.mxu0 %v2980_v13  ;;  %2728 = vmatmul.mubr.msk.f32.vlgmr.msra.gmra.mrb[0].mxu1 %vm424_vm1, %v417_v8  ;;  %v1075_v22 = vrot.slane %v2660_v20, %v2961_v6  ;;  %v1200_v24 = vrot.slane %v2667_v23, %v2964_v7  ;;  %v1204_v25 = vrot.slane %v2667_v23, %v2961_v6  ;;  %vm951_vm4 = vcmask 130048   ;;  %s2868_s27 = smov 110   ;;  %s2870_s29 = smov 95  }
  0x16   : > { %2633 = vmatmul.mubr.msk.f32.vlgmr.msra.gmra.mrb[0].mxu0 %vm424_vm1, %v417_v8  ;;  %604 = vrot.lane.b32.xlu1 %v601_v9, %s2856_s17  ;;  %v1329_v27 = vrot.slane %v2674_v26, %v2964_v7  ;;  %v1333_v28 = vrot.slane %v2674_v26, %v2961_v6  ;;  %v1458_v30 = vrot.slane %v2681_v29, %v2964_v7  ;;  %vm1080_vm5 = vcmask 138240   ;;  %s2871_s18 = smov 94   ;;  %s2872_s30 = smov 125  }
  0x17   : > { %602 = vrot.lane.b32.xlu0 %v597_v14, %s2856_s17  ;;  %705 = vmatprep.mubr.f32.mxu0 %v2853_v1  ;;  %v1462_v31 = vrot.slane %v2681_v29, %v2961_v6  ;;  %s2862_s17 = smov 33   ;;  %v1587_v52 = vrot.slane %v2688_v47, %v2964_v7  ;;  %v1591_v57 = vrot.slane %v2688_v47, %v2961_v6  ;;  %vm1209_vm6 = vcmask 146432  }
  0x18   : > { %1878 = vmatprep.mubr.f32.mxu1 %v2853_v1  ;;  %vm1338_vm7 = vcmask 261120   ;;  %vm1467_vm8 = vcmask 269312   ;;  %vm626_vm9 = vcmask 1039360   ;;  %vm636_vm10 = vcmask 1043456  }
  0x19   : > { %vm629_vm11 = vcmask 31744   ;;  %vm1596_vm12 = vcmask 277504   ;;  %vm842_vm13 = vcmask 1031168   ;;  %vm971_vm14 = vcmask 916480  }
  0x1a   : > { %818 = vrot.lane.b32.xlu1 %v813_v15, %s2857_s20  ;;  %vm1100_vm15 = vcmask 908288   ;;  %vm1229_vm0 = vcmask 900096  }
  0x1b   : > { %820 = vrot.lane.b32.xlu0 %v817_v16, %s2857_s20  ;;  %s2863_s20 = smov 127  }
  0x1e   : > { %947 = vrot.lane.b32.xlu1 %v942_v18, %s2858_s25 }
  0x1f   : > { %949 = vrot.lane.b32.xlu0 %v946_v19, %s2858_s25  ;;  %s2866_s25 = smov 112  }
  0x22   : > { %1076 = vrot.lane.b32.xlu1 %v1071_v21, %s2859_s28 }
  0x23   : > { %1078 = vrot.lane.b32.xlu0 %v1075_v22, %s2859_s28  ;;  %s2869_s28 = smov 96  }
  0x26   : > { %1205 = vrot.lane.b32.xlu1 %v1200_v24, %s2860_s13 }
  0x27   : > { %1207 = vrot.lane.b32.xlu0 %v1204_v25, %s2860_s13 }
  0x2a   : > { %1334 = vrot.lane.b32.xlu1 %v1329_v27, %s2861_s16 }
  0x2b   : > { %1336 = vrot.lane.b32.xlu0 %v1333_v28, %s2861_s16 }
  0x2e   : > { %1463 = vrot.lane.b32.xlu1 %v1458_v30, %s2862_s17 }
  0x2f   : > { %1465 = vrot.lane.b32.xlu0 %v1462_v31, %s2862_s17 }
  0x88   : > { %v605_v42 = vpop.permute.xlu1 %604 }
  0x8c   : > { %v819_v53 = vpop.permute.xlu1 %818 }
  0x8f   : > { %v422_v32 = vpop.permute.xlu0 %421 }
  0x90   : > { %v948_v59 = vpop.permute.xlu1 %947 }
  0x93   : > { %v603_v43 = vpop.permute.xlu0 %602 }
  0x94   : > { %v607_v51 = vsel %vm606_vm2, %v603_v43, %v605_v42  ;;  %v1077_v0 = vpop.permute.xlu1 %1076  ;;  %vm1358_vm2 = vcmask 785408  }
  0x97   : > { %v821_v54 = vpop.permute.xlu0 %820 }
  0x98   : > { %v823_v55 = vsel %vm822_vm3, %v819_v53, %v821_v54  ;;  %v1206_v14 = vpop.permute.xlu1 %1205  ;;  %vm1487_vm3 = vcmask 777216  }
  0x9b   : > { %v950_v60 = vpop.permute.xlu0 %949 }
  0x9c   : > { %v952_v63 = vsel %vm951_vm4, %v948_v59, %v950_v60  ;;  %v1335_v19 = vpop.permute.xlu1 %1334 }
  0x9f   : > { %v1079_v2 = vpop.permute.xlu0 %1078 }
  0xa0   : > { %v1081_v5 = vsel %vm1080_vm5, %v1077_v0, %v1079_v2  ;;  %v1464_v26 = vpop.permute.xlu1 %1463  ;;  %vm1616_vm5 = vcmask 769024  }
  0xa3   : > { %v1208_v15 = vpop.permute.xlu0 %1207 }
  0xa4   : > { %v1210_v18 = vsel %vm1209_vm6, %v1206_v14, %v1208_v15 }
  0xa7   : > { %v1337_v20 = vpop.permute.xlu0 %1336 }
  0xa8   : > { %v1339_v22 = vsel %vm1338_vm7, %v1335_v19, %v1337_v20 }
  0xab   : > { %v1466_v27 = vpop.permute.xlu0 %1465 }
  0xac   : > { %v1468_v30 = vsel %vm1467_vm8, %v1464_v26, %v1466_v27 }
  0xe8   : > { %v565_v33 = vpop.f32.mrb[0].mxu1 }
  0xe9   : > { %v566_v34 = vadd.f32 %v565_v33, %v422_v32  ;;  %v494_v35 = vpop.f32.mrb[0].mxu0  ;;  %v2729_v36 = vpop.f32.mrb[1].mxu1 }
  0xea   : > { %v495_v37 = vadd.f32 %v494_v35, %v422_v32  ;;  %v496_v38 = vpop.f32.mrb[1].mxu0  ;;  %v575_v35 = vld [vmem:[%s3573_s1] sm:$0x3] }
  0xeb   : > { %v571_v39 = vmax.f32 %v566_v34, 0.0  ;;  %v497_v40 = vadd.f32 %v496_v38, %v422_v32 }
  0xec   : > { %v569_v41 = vmax.f32 %v495_v37, 0.0  ;;  %v584_v37 = vrot.slane %v575_v35, %v2961_v6 }
  0xed   : > { %v3017_v44 = vmin.f32 %v571_v39, 6.0  ;;  %v570_v45 = vmax.f32 %v497_v40, 0.0  ;;  %v580_v39 = vrot.slane %v575_v35, %v2964_v7 }
  0xee   : > { %v3019_v46 = vmin.f32 %v569_v41, 6.0 }
  0xef   : > { %v613_v48 = vmul.f32 %v605_v42, %v3017_v44  ;;  %v3025_v49 = vmin.f32 %v570_v45, 6.0  ;;  %v829_v62 = vmul.f32 %v821_v54, %v3017_v44  ;;  %v958_v3 = vmul.f32 %v950_v60, %v3017_v44 }
  0xf0   : > { %v611_v50 = vmul.f32 %v603_v43, %v3019_v46  ;;  %v827_v61 = vmul.f32 %v819_v53, %v3019_v46  ;;  %v956_v10 = vmul.f32 %v948_v59, %v3019_v46  ;;  %v1085_v16 = vmul.f32 %v1077_v0, %v3019_v46  ;;  %v2636_v43 = vld [vmem:[%s3576_s4 + $0x10] sm:$0xff]  ;;  %v2637_v53 = vld [vmem:[%s3576_s4 + $0x18] sm:$0xff] }
  0xf1   : > { %624 = vrot.lane.b32.xlu0 %v613_v48, %s2863_s20  ;;  %v612_v56 = vmul.f32 %v607_v51, %v3025_v49  ;;  %v828_v58 = vmul.f32 %v823_v55, %v3025_v49  ;;  %v957_v8 = vmul.f32 %v952_v63, %v3025_v49  ;;  %v1086_v9 = vmul.f32 %v1081_v5, %v3025_v49 }
  0xf2   : > { %620 = vrot.lane.b32.xlu1 %v611_v50, %s2863_s20  ;;  %v1087_v17 = vmul.f32 %v1079_v2, %v3017_v44  ;;  %v1216_v21 = vmul.f32 %v1208_v15, %v3017_v44  ;;  %v1215_v23 = vmul.f32 %v1210_v18, %v3025_v49  ;;  %v1344_v24 = vmul.f32 %v1339_v22, %v3025_v49  ;;  %v2647_v2 = vld [vmem:[%s3576_s4 + $0x20] sm:$0xff]  ;;  %v2655_v22 = vld [vmem:[%s3576_s4 + $0x38] sm:$0xff] }
  0xf3   : > { %v1214_v25 = vmul.f32 %v1206_v14, %v3019_v46  ;;  %v1343_v28 = vmul.f32 %v1335_v19, %v3019_v46  ;;  %v1345_v29 = vmul.f32 %v1337_v20, %v3017_v44  ;;  %v1474_v31 = vmul.f32 %v1466_v27, %v3017_v44  ;;  %v2648_v14 = vld [vmem:[%s3576_s4 + $0x28] sm:$0xff]  ;;  %v1710_v27 = vld [vmem:[%s3577_s5] sm:$0xff] }
  0xf4   : > { %v1473_v32 = vmul.f32 %v1468_v30, %v3025_v49  ;;  %v1472_v33 = vmul.f32 %v1464_v26, %v3019_v46  ;;  %v588_v45 = vmul.f32 %v584_v37, %v3025_v49  ;;  %v587_v48 = vmul.f32 %v580_v39, %v3019_v46  ;;  %v2669_v37 = vld [vmem:[%s3576_s4 + $0x58] sm:$0xff]  ;;  %v2675_v39 = vld [vmem:[%s3576_s4 + $0x60] sm:$0xff] }
  0xf5   : > { %1592 = vrot.lane.b32.xlu0 %v1587_v52, %s2864_s23 }
  0xf6   : > { %622 = vrot.lane.b32.xlu1 %v612_v56, %s2863_s20 }
  0xf9   : > { %838 = vrot.lane.b32.xlu0 %v828_v58, %s2865_s24 }
  0xfa   : > { %1594 = vrot.lane.b32.xlu1 %v1591_v57, %s2864_s23 }
  0xfd   : > { %836 = vrot.lane.b32.xlu0 %v827_v61, %s2865_s24 }
  0xfe   : > { %840 = vrot.lane.b32.xlu1 %v829_v62, %s2865_s24  ;;  %v1711_v62 = vld [vmem:[%s3577_s5 + $0x8] sm:$0xff] }
 0x101   : > { %969 = vrot.lane.b32.xlu0 %v958_v3, %s2866_s25 }
 0x102   : > { %967 = vrot.lane.b32.xlu1 %v957_v8, %s2866_s25 }
 0x105   : > { %1096 = vrot.lane.b32.xlu0 %v1086_v9, %s2867_s26 }
 0x106   : > { %965 = vrot.lane.b32.xlu1 %v956_v10, %s2866_s25  ;;  %v1742_v10 = vld [vmem:[%s3579_s7] sm:$0xff] }
 0x109   : > { %1094 = vrot.lane.b32.xlu0 %v1085_v16, %s2867_s26  ;;  %v1744_v16 = vld [vmem:[%s3579_s7 + $0x10] sm:$0xff] }
 0x10a   : > { %1098 = vrot.lane.b32.xlu1 %v1087_v17, %s2867_s26  ;;  %v2654_v17 = vld [vmem:[%s3576_s4 + $0x30] sm:$0xff] }
 0x10d   : > { %1227 = vrot.lane.b32.xlu0 %v1216_v21, %s2868_s27  ;;  %v1746_v21 = vld [vmem:[%s3579_s7 + $0x20] sm:$0xff] }
 0x10e   : > { %1225 = vrot.lane.b32.xlu1 %v1215_v23, %s2868_s27 }
 0x111   : > { %1354 = vrot.lane.b32.xlu0 %v1344_v24, %s2869_s28  ;;  %v1748_v24 = vld [vmem:[%s3579_s7 + $0x30] sm:$0xff] }
 0x112   : > { %1223 = vrot.lane.b32.xlu1 %v1214_v25, %s2868_s27  ;;  %v2661_v25 = vld [vmem:[%s3576_s4 + $0x40] sm:$0xff] }
 0x115   : > { %1352 = vrot.lane.b32.xlu0 %v1343_v28, %s2869_s28 }
 0x116   : > { %1356 = vrot.lane.b32.xlu1 %v1345_v29, %s2869_s28 }
 0x119   : > { %1485 = vrot.lane.b32.xlu0 %v1474_v31, %s2870_s29  ;;  %v2662_v31 = vld [vmem:[%s3576_s4 + $0x48] sm:$0xff] }
 0x11a   : > { %1483 = vrot.lane.b32.xlu1 %v1473_v32, %s2870_s29  ;;  %v2668_v32 = vld [vmem:[%s3576_s4 + $0x50] sm:$0xff] }
 0x11e   : > { %1481 = vrot.lane.b32.xlu1 %v1472_v33, %s2870_s29 }
 0x163   : > { %v625_v34 = vpop.permute.xlu0 %624 }
 0x164   : > { %v621_v36 = vpop.permute.xlu1 %620 }
 0x167   : > { %v1593_v38 = vpop.permute.xlu0 %1592 }
 0x168   : > { %v623_v40 = vpop.permute.xlu1 %622  ;;  %v1601_v58 = vmul.f32 %v1593_v38, %v3019_v46  ;;  %v590_v46 = vld [vmem:[%s3576_s4 + $0x8] sm:$0xff] }
 0x169   : > { %v627_v41 = vsel %vm626_vm9, %v621_v36, %v623_v40  ;;  %v628_v42 = vsel %vm626_vm9, %v623_v40, %v625_v34  ;;  %v1745_v40 = vld [vmem:[%s3579_s7 + $0x18] sm:$0xff] }
 0x16a   : > { %2638 = vmatprep.subr.msk.mxu0 %vm636_vm10, %v628_v42  ;;  %v1747_v42 = vld [vmem:[%s3579_s7 + $0x28] sm:$0xff] }
 0x16b   : > { %v839_v47 = vpop.permute.xlu0 %838  ;;  %2639 = vmatpush1.msk.msra.mxu0 %vm636_vm10, %v627_v41  ;;  %v2676_v41 = vld [vmem:[%s3576_s4 + $0x68] sm:$0xff] }
 0x16c   : > { %2640 = vmatmul.mubr.msk.f32.vlgmr.msra.gmra.mrb[2].mxu0 %vm629_vm11, %v2636_v43  ;;  %2642 = vmatprep.subr.msk.mxu0 %vm636_vm10, %v588_v45  ;;  %v1595_v50 = vpop.permute.xlu1 %1594  ;;  %v2682_v43 = vld [vmem:[%s3576_s4 + $0x70] sm:$0xff]  ;;  %v1749_v45 = vld [vmem:[%s3579_s7 + $0x38] sm:$0xff] }
 0x16d   : > { %v1597_v51 = vsel %vm1596_vm12, %v1593_v38, %v1595_v50  ;;  %v1603_v52 = vmul.f32 %v1595_v50, %v3017_v44  ;;  %2643 = vmatpush1.msk.msra.mxu0 %vm636_vm10, %v587_v48  ;;  %711 = vmatprep.mubr.f32.mxu0 %v2853_v1  ;;  %v589_v44 = vld [vmem:[%s3576_s4] sm:$0xff] }
 0x16e   : > { %v1602_v54 = vmul.f32 %v1597_v51, %v3025_v49 }
 0x16f   : > { %v837_v55 = vpop.permute.xlu0 %836  ;;  %1614 = vrot.lane.b32.xlu1 %v1603_v52, %s2871_s18 }
 0x170   : > { %2641 = vmatmul.mubr.msk.f32.gmra.mrb[4].mxu0 %vm629_vm11, %v2637_v53  ;;  %1612 = vrot.lane.b32.xlu0 %v1602_v54, %s2871_s18  ;;  %v841_v56 = vpop.permute.xlu1 %840  ;;  %v843_v59 = vsel %vm842_vm13, %v837_v55, %v839_v47  ;;  %v2689_v53 = vld [vmem:[%s3576_s4 + $0x80] sm:$0xff]  ;;  %v2690_v55 = vld [vmem:[%s3576_s4 + $0x88] sm:$0xff] }
 0x171   : > { %v844_v57 = vsel %vm842_vm13, %v839_v47, %v841_v56  ;;  %794 = vmatprep.mubr.f32.mxu0 %v2853_v1  ;;  %v2683_v47 = vld [vmem:[%s3576_s4 + $0x78] sm:$0xff] }
 0x172   : > { %2649 = vmatprep.subr.msk.mxu0 %vm636_vm10, %v844_v57 }
 0x173   : > { %v970_v49 = vpop.permute.xlu0 %969  ;;  %1714 = vperm.xlu1 %2812, %v1710_v27   ;;  %v1741_v27 = vld [vmem:[%s3578_s6 + $0x38] sm:$0xff] }
 0x174   : > { %1610 = vrot.lane.b32.xlu0 %v1601_v58, %s2871_s18  ;;  %v968_v60 = vpop.permute.xlu1 %967  ;;  %2644 = vmatmul.mubr.msk.f32.vlgmr.msra.gmra.mrb[2].mxu0 %vm629_vm11, %v589_v44 }
 0x175   : > { %v973_v61 = vsel %vm971_vm14, %v968_v60, %v970_v49  ;;  %2650 = vmatpush1.msk.msra.mxu0 %vm636_vm10, %v843_v59  ;;  %800 = vmatprep.mubr.f32.mxu0 %v2853_v1 }
 0x176   : > { %2656 = vmatprep.subr.msk.mxu0 %vm636_vm10, %v973_v61 }
 0x177   : > { %v1097_v63 = vpop.permute.xlu0 %1096  ;;  %1988 = vrot.lane.b32.xlu1 %v2976_v11, %s2867_s26  ;;  %v1743_v11 = vld [vmem:[%s3579_s7 + $0x8] sm:$0xff] }
 0x178   : > { %1719 = vperm.xlu0 %2811, %v1711_v62   ;;  %v966_v0 = vpop.permute.xlu1 %965  ;;  %2645 = vmatmul.mubr.msk.f32.gmra.mrb[4].mxu0 %vm629_vm11, %v590_v46 }
 0x179   : > { %919 = vmatprep.mubr.f32.mxu0 %v2853_v1  ;;  %v972_v5 = vsel %vm971_vm14, %v966_v0, %v968_v60 }
 0x17b   : > { %v1095_v3 = vpop.permute.xlu0 %1094  ;;  %1986 = vrot.lane.b32.xlu1 %v2980_v13, %s2867_s26 }
 0x17c   : > { %1990 = vrot.lane.b32.xlu0 %v2978_v12, %s2867_s26  ;;  %v1099_v8 = vpop.permute.xlu1 %1098  ;;  %2651 = vmatmul.mubr.msk.f32.vlgmr.msra.gmra.mrb[2].mxu0 %vm629_vm11, %v2647_v2  ;;  %v1101_v18 = vsel %vm1100_vm15, %v1095_v3, %v1097_v63 }
 0x17d   : > { %v1102_v9 = vsel %vm1100_vm15, %v1097_v63, %v1099_v8  ;;  %2657 = vmatpush1.msk.msra.mxu0 %vm636_vm10, %v972_v5  ;;  %925 = vmatprep.mubr.f32.mxu0 %v2853_v1 }
 0x17e   : > { %2663 = vmatprep.subr.msk.mxu0 %vm636_vm10, %v1102_v9 }
 0x17f   : > { %v1228_v12 = vpop.permute.xlu0 %1227  ;;  %1757 = vperm.xlu1 %2812, %v1743_v11  }
 0x180   : > { %1752 = vperm.xlu0 %2811, %v1742_v10   ;;  %v1226_v15 = vpop.permute.xlu1 %1225  ;;  %2652 = vmatmul.mubr.msk.f32.gmra.mrb[4].mxu0 %vm629_vm11, %v2648_v14 }
 0x181   : > { %1048 = vmatprep.mubr.f32.mxu0 %v2853_v1  ;;  %v1231_v20 = vsel %vm1229_vm0, %v1226_v15, %v1228_v12 }
 0x183   : > { %v1355_v23 = vpop.permute.xlu0 %1354  ;;  %1767 = vperm.xlu1 %2812, %v1745_v40  }
 0x184   : > { %1762 = vperm.xlu0 %2811, %v1744_v16   ;;  %v1224_v19 = vpop.permute.xlu1 %1223  ;;  %2658 = vmatmul.mubr.msk.f32.vlgmr.msra.gmra.mrb[2].mxu0 %vm629_vm11, %v2654_v17 }
 0x185   : > { %2664 = vmatpush1.msk.msra.mxu0 %vm636_vm10, %v1101_v18  ;;  %1054 = vmatprep.mubr.f32.mxu0 %v2853_v1  ;;  %v1230_v28 = vsel %vm1229_vm0, %v1224_v19, %v1226_v15  ;;  %v1734_v19 = vld [vmem:[%s3578_s6] sm:$0xff] }
 0x186   : > { %2670 = vmatprep.subr.msk.mxu0 %vm636_vm10, %v1231_v20 }
 0x187   : > { %v1353_v29 = vpop.permute.xlu0 %1352  ;;  %1777 = vperm.xlu1 %2812, %v1747_v42  }
 0x188   : > { %1772 = vperm.xlu0 %2811, %v1746_v21   ;;  %2659 = vmatmul.mubr.msk.f32.gmra.mrb[4].mxu0 %vm629_vm11, %v2655_v22  ;;  %v1357_v26 = vpop.permute.xlu1 %1356  ;;  %v1359_v35 = vsel %vm1358_vm2, %v1353_v29, %v1355_v23  ;;  %v1735_v21 = vld [vmem:[%s3578_s6 + $0x8] sm:$0xff]  ;;  %v1736_v22 = vld [vmem:[%s3578_s6 + $0x10] sm:$0xff] }
 0x189   : > { %1177 = vmatprep.mubr.f32.mxu0 %v2853_v1  ;;  %v1360_v30 = vsel %vm1358_vm2, %v1355_v23, %v1357_v26  ;;  %v1737_v23 = vld [vmem:[%s3578_s6 + $0x18] sm:$0xff]  ;;  %v1740_v26 = vld [vmem:[%s3578_s6 + $0x30] sm:$0xff]  ;;  %v1928_v29 = vld [vmem:[%s3580_s8 + $0x8] sm:$0xff] }
 0x18b   : > { %v1486_v33 = vpop.permute.xlu0 %1485  ;;  %1787 = vperm.xlu1 %2812, %v1749_v45  }
 0x18c   : > { %1782 = vperm.xlu0 %2811, %v1748_v24   ;;  %2665 = vmatmul.mubr.msk.f32.vlgmr.msra.gmra.mrb[2].mxu0 %vm629_vm11, %v2661_v25  ;;  %v1484_v34 = vpop.permute.xlu1 %1483  ;;  %v1738_v24 = vld [vmem:[%s3578_s6 + $0x20] sm:$0xff]  ;;  %v1739_v25 = vld [vmem:[%s3578_s6 + $0x28] sm:$0xff] }
 0x18d   : > { %2671 = vmatpush1.msk.msra.mxu0 %vm636_vm10, %v1230_v28  ;;  %1183 = vmatprep.mubr.f32.mxu0 %v2853_v1  ;;  %v1489_v36 = vsel %vm1487_vm3, %v1484_v34, %v1486_v33  ;;  %v1927_v28 = vld [vmem:[%s3580_s8] sm:$0xff]  ;;  %v1932_v33 = vld [vmem:[%s3580_s8 + $0x28] sm:$0xff] }
 0x18e   : > { %2677 = vmatprep.subr.msk.mxu0 %vm636_vm10, %v1360_v30  ;;  %v1929_v30 = vld [vmem:[%s3580_s8 + $0x10] sm:$0xff] }
 0x190   : > { %2666 = vmatmul.mubr.msk.f32.gmra.mrb[4].mxu0 %vm629_vm11, %v2662_v31  ;;  %v1482_v38 = vpop.permute.xlu1 %1481  ;;  %v1930_v31 = vld [vmem:[%s3580_s8 + $0x18] sm:$0xff] }
 0x191   : > { %1306 = vmatprep.mubr.f32.mxu0 %v2853_v1  ;;  %v1488_v13 = vsel %vm1487_vm3, %v1482_v38, %v1484_v34  ;;  %v1933_v34 = vld [vmem:[%s3580_s8 + $0x30] sm:$0xff] }
 0x194   : > { %2672 = vmatmul.mubr.msk.f32.vlgmr.msra.gmra.mrb[2].mxu0 %vm629_vm11, %v2668_v32  ;;  %v1931_v32 = vld [vmem:[%s3580_s8 + $0x20] sm:$0xff] }
 0x195   : > { %2678 = vmatpush1.msk.msra.mxu0 %vm636_vm10, %v1359_v35  ;;  %1312 = vmatprep.mubr.f32.mxu0 %v2853_v1  ;;  %v1934_v35 = vld [vmem:[%s3580_s8 + $0x38] sm:$0xff] }
 0x196   : > { %2684 = vmatprep.subr.msk.mxu0 %vm636_vm10, %v1489_v36 }
 0x198   : > { %2673 = vmatmul.mubr.msk.f32.gmra.mrb[4].mxu0 %vm629_vm11, %v2669_v37 }
 0x199   : > { %1435 = vmatprep.mubr.f32.mxu0 %v2853_v1 }
 0x19c   : > { %2679 = vmatmul.mubr.msk.f32.vlgmr.msra.gmra.mrb[2].mxu0 %vm629_vm11, %v2675_v39 }
 0x19d   : > { %2685 = vmatpush1.msk.msra.mxu0 %vm636_vm10, %v1488_v13  ;;  %1441 = vmatprep.mubr.f32.mxu0 %v2853_v1 }
 0x1a0   : > { %2680 = vmatmul.mubr.msk.f32.gmra.mrb[4].mxu0 %vm629_vm11, %v2676_v41 }
 0x1a1   : > { %1564 = vmatprep.mubr.f32.mxu0 %v2853_v1 }
 0x1a4   : > { %2686 = vmatmul.mubr.msk.f32.vlgmr.msra.gmra.mrb[2].mxu0 %vm629_vm11, %v2682_v43 }
 0x1a5   : > { %1570 = vmatprep.mubr.f32.mxu0 %v2853_v1 }
 0x1a8   : > { %2687 = vmatmul.mubr.msk.f32.gmra.mrb[4].mxu0 %vm629_vm11, %v2683_v47 }
 0x1a9   : > { %1693 = vmatprep.mubr.f32.mxu0 %v2853_v1 }
 0x1e1   : > { %v1615_v48 = vpop.permute.xlu1 %1614 }
 0x1e2   : > { %v1613_v50 = vpop.permute.xlu0 %1612 }
 0x1e3   : > { %v1618_v51 = vsel %vm1616_vm5, %v1613_v50, %v1615_v48 }
 0x1e4   : > { %2691 = vmatprep.subr.msk.mxu0 %vm636_vm10, %v1618_v51 }
 0x1e6   : > { %v1611_v52 = vpop.permute.xlu0 %1610 }
 0x1e7   : > { %v1617_v54 = vsel %vm1616_vm5, %v1611_v52, %v1613_v50 }
 0x1e8   : > { %2692 = vmatpush1.msk.msra.mxu0 %vm636_vm10, %v1617_v54 }
 0x1e9   : > { %2693 = vmatmul.mubr.msk.f32.vlgmr.msra.gmra.mrb[2].mxu0 %vm629_vm11, %v2689_v53 }
 0x1ea   : > { %1699 = vmatprep.mubr.f32.mxu0 %v2853_v1 }
 0x1ed   : > { %2694 = vmatmul.mubr.msk.f32.gmra.mrb[4].mxu0 %vm629_vm11, %v2690_v55 }
 0x1f2   : > { %v1715_v56 = vpop.permute.xlu1 %1714 }
 0x1f6   : > { %v1989_v5 = vpop.permute.xlu1 %1988 }
 0x1f7   : > { %v1720_v59 = vpop.permute.xlu0 %1719 }
 0x1fa   : > { %v1987_v18 = vpop.permute.xlu1 %1986 }
 0x1fb   : > { %v1991_v15 = vpop.permute.xlu0 %1990  ;;  %v1992_v20 = vsel %vm1100_vm15, %v1987_v18, %v1989_v5 }
 0x1fc   : > { %v1993_v17 = vsel %vm1100_vm15, %v1989_v5, %v1991_v15 }
 0x1fe   : > { %v1758_v11 = vpop.permute.xlu1 %1757 }
 0x1ff   : > { %v1753_v39 = vpop.permute.xlu0 %1752 }
 0x202   : > { %v1768_v50 = vpop.permute.xlu1 %1767 }
 0x203   : > { %v1763_v52 = vpop.permute.xlu0 %1762 }
 0x2bc   : > { %v1695_v57 = vpop.f32.mrb[2].mxu0 }
 0x2bd   : > { %v1722_v44 = vadd.f32 %v1715_v56, %v1695_v57  ;;  %v1697_v58 = vpop.f32.mrb[3].mxu0 }
 0x2be   : > { %v1723_v49 = vadd.f32 %v1715_v56, %v1697_v58 }
 0x2bf   : > { %v1726_v61 = vmax.f32 %v1722_v44, 0.0 }
 0x2c0   : > { %v1701_v60 = vpop.f32.mrb[4].mxu0  ;;  %v1727_v63 = vmax.f32 %v1723_v49, 0.0 }
 0x2c1   : > { %v1724_v62 = vadd.f32 %v1720_v59, %v1701_v60  ;;  %v1703_v46 = vpop.f32.mrb[5].mxu0  ;;  %v1730_v8 = vmin.f32 %v1726_v61, 6.0  ;;  %v1778_v60 = vpop.permute.xlu1 %1777 }
 0x2c2   : > { %v1725_v0 = vadd.f32 %v1720_v59, %v1703_v46  ;;  %v1731_v10 = vmin.f32 %v1727_v63, 6.0 }
 0x2c3   : > { %v1728_v2 = vmax.f32 %v1724_v62, 0.0  ;;  %v1773_v62 = vpop.permute.xlu0 %1772 }
 0x2c4   : > { %v1729_v3 = vmax.f32 %v1725_v0, 0.0 }
 0x2c5   : > { %v1732_v9 = vmin.f32 %v1728_v2, 6.0 }
 0x2c6   : > { %v1733_v14 = vmin.f32 %v1729_v3, 6.0 }
 0x2c7   : > { %v2732_v12 = vpack.c.bf16 %v1732_v9, %v1730_v8  ;;  %v1783_v15 = vpop.permute.xlu0 %1782 }
 0x2c8   : > { %v2730_v16 = vpack.c.bf16 %v1733_v14, %v1731_v10  ;;  %v1788_v14 = vpop.permute.xlu1 %1787 }
 0x2ca   : > { %2731 = vmatprep.subr.bf16.mxu1 %v2730_v16 }
 0x2cb   : > { %2733 = vmatpush1.bf16.msra.mxu1 %v2732_v12 }
 0x2cc   : > { %2020 = vmatprep.subr.mxu1 %v1993_v17 }
 0x2ce   : > { %2695 = vmatmul.mubr.msk.f32.vlgmr.msra.gmra.mrb[2].mxu1 %vm951_vm4, %v1734_v19 }
 0x2cf   : > { %1884 = vmatprep.mubr.f32.mxu1 %v2853_v1  ;;  %2021 = vmatpush1.msra.mxu1 %v1992_v20 }
 0x2d2   : > { %2696 = vmatmul.mubr.msk.f32.gmra.mrb[4].mxu1 %vm951_vm4, %v1735_v21 }
 0x2d3   : > { %1890 = vmatprep.mubr.f32.mxu1 %v2853_v1 }
 0x2d6   : > { %2697 = vmatmul.mubr.msk.f32.gmra.mrb[6].mxu1 %vm951_vm4, %v1736_v22 }
 0x2d7   : > { %1896 = vmatprep.mubr.f32.mxu1 %v2853_v1 }
 0x2da   : > { %2698 = vmatmul.mubr.msk.f32.gmra.mrb[8].mxu1 %vm951_vm4, %v1737_v23  ;;  %v2133_v23 = vld [vmem:[%s3582_s10] sm:$0xf] }
 0x2db   : > { %1902 = vmatprep.mubr.f32.mxu1 %v2853_v1 }
 0x2de   : > { %2699 = vmatmul.mubr.msk.f32.gmra.mrb[10].mxu1 %vm951_vm4, %v1738_v24 }
 0x2df   : > { %1908 = vmatprep.mubr.f32.mxu1 %v2853_v1 }
 0x2e2   : > { %2700 = vmatmul.mubr.msk.f32.gmra.mrb[12].mxu1 %vm951_vm4, %v1739_v25 }
 0x2e3   : > { %1914 = vmatprep.mubr.f32.mxu1 %v2853_v1 }
 0x2e6   : > { %2701 = vmatmul.mubr.msk.f32.gmra.mrb[14].mxu1 %vm951_vm4, %v1740_v26 }
 0x2e7   : > { %1920 = vmatprep.mubr.f32.mxu1 %v2853_v1 }
 0x2ea   : > { %2702 = vmatmul.mubr.msk.f32.gmra.mrb[16].mxu1 %vm951_vm4, %v1741_v27 }
 0x2eb   : > { %2084 = vmatprep.mubr.f32.mxu1 %v2853_v1 }
 0x2ee   : > { %2703 = vmatmul.mubr.msk.f32.vlgmr.msra.gmra.mrb[18].mxu1 %vm424_vm1, %v1927_v28 }
 0x2ef   : > { %2090 = vmatprep.mubr.f32.mxu1 %v2853_v1 }
 0x2f2   : > { %2704 = vmatmul.mubr.msk.f32.gmra.mrb[20].mxu1 %vm424_vm1, %v1928_v29 }
 0x2f3   : > { %2096 = vmatprep.mubr.f32.mxu1 %v2853_v1 }
 0x2f6   : > { %2705 = vmatmul.mubr.msk.f32.gmra.mrb[22].mxu1 %vm424_vm1, %v1929_v30 }
 0x2f7   : > { %2102 = vmatprep.mubr.f32.mxu1 %v2853_v1 }
 0x2fa   : > { %2706 = vmatmul.mubr.msk.f32.gmra.mrb[24].mxu1 %vm424_vm1, %v1930_v31 }
 0x2fb   : > { %2108 = vmatprep.mubr.f32.mxu1 %v2853_v1 }
 0x2fe   : > { %2707 = vmatmul.mubr.msk.f32.gmra.mrb[26].mxu1 %vm424_vm1, %v1931_v32 }
 0x2ff   : > { %2114 = vmatprep.mubr.f32.mxu1 %v2853_v1 }
 0x302   : > { %2708 = vmatmul.mubr.msk.f32.gmra.mrb[28].mxu1 %vm424_vm1, %v1932_v33 }
 0x303   : > { %2120 = vmatprep.mubr.f32.mxu1 %v2853_v1 }
 0x306   : > { %2709 = vmatmul.mubr.msk.f32.gmra.mrb[30].mxu1 %vm424_vm1, %v1933_v34 }
 0x307   : > { %2126 = vmatprep.mubr.f32.mxu1 %v2853_v1 }
 0x30a   : > { %2710 = vmatmul.mubr.msk.f32.gmra.mrb[32].mxu1 %vm424_vm1, %v1934_v35  ;;  %vm2134_vm1 = vcmask 523264  }
 0x30b   : > { %2202 = vmatprep.mubr.f32.mxu1 %v2853_v1 }
 0x3a1   : > { %v1880_v36 = vpop.f32.mrb[2].mxu1 }
 0x3a2   : > { %v1882_v37 = vpop.f32.mrb[3].mxu1  ;;  %v3310_v43 = vadd.f32 %v1880_v36, %v1753_v39 }
 0x3a3   : > { %v3306_v41 = vadd.f32 %v1882_v37, %v1753_v39 }
 0x3a5   : > { %v1886_v38 = vpop.f32.mrb[4].mxu1 }
 0x3a6   : > { %v3304_v40 = vadd.f32 %v1886_v38, %v1758_v11  ;;  %v1888_v13 = vpop.f32.mrb[5].mxu1 }
 0x3a7   : > { %v3308_v42 = vadd.f32 %v1888_v13, %v1758_v11 }
 0x3a8   : > { %v2736_v1 = vpack.c.bf16 %v3304_v40, %v3310_v43 }
 0x3a9   : > { %v2734_v45 = vpack.c.bf16 %v3308_v42, %v3306_v41  ;;  %v1892_v47 = vpop.f32.mrb[6].mxu1 }
 0x3aa   : > { %v1894_v48 = vpop.f32.mrb[7].mxu1  ;;  %v3322_v57 = vadd.f32 %v1892_v47, %v1763_v52 }
 0x3ab   : > { %2735 = vmatprep.subr.bf16.mxu1 %v2734_v45  ;;  %v3318_v55 = vadd.f32 %v1894_v48, %v1763_v52 }
 0x3ac   : > { %2737 = vmatpush1.bf16.msra.mxu1 %v2736_v1 }
 0x3ad   : > { %v1898_v51 = vpop.f32.mrb[8].mxu1 }
 0x3ae   : > { %v3316_v53 = vadd.f32 %v1898_v51, %v1768_v50  ;;  %v1900_v54 = vpop.f32.mrb[9].mxu1  ;;  %v2300_v51 = vsub.s32 2, %v2954_v4 }
 0x3af   : > { %v3320_v56 = vadd.f32 %v1900_v54, %v1768_v50 }
 0x3b0   : > { %v2740_v49 = vpack.c.bf16 %v3316_v53, %v3322_v57 }
 0x3b1   : > { %v2738_v44 = vpack.c.bf16 %v3320_v56, %v3318_v55  ;;  %v1904_v58 = vpop.f32.mrb[10].mxu1 }
 0x3b2   : > { %v1906_v59 = vpop.f32.mrb[11].mxu1  ;;  %v3334_v3 = vadd.f32 %v1904_v58, %v1773_v62 }
 0x3b3   : > { %2739 = vmatprep.subr.bf16.mxu1 %v2738_v44  ;;  %v3330_v0 = vadd.f32 %v1906_v59, %v1773_v62  ;;  %v3393_v44 = vld [vmem:[%s3583_s11] sm:$0xff]  ;;  %v2352_v59 = vsub.s32 3, %v2954_v4  ;;  %v2225_v62 = vld [vmem:[%s3583_s11 + $0x38] sm:$0xff]  ;;  %v2220_v4 = vld [vmem:[%s3583_s11 + $0x10] sm:$0xff] }
 0x3b4   : > { %2741 = vmatpush1.bf16.msra.mxu1 %v2740_v49 }
 0x3b5   : > { %v1910_v61 = vpop.f32.mrb[12].mxu1 }
 0x3b6   : > { %v3328_v46 = vadd.f32 %v1910_v61, %v1778_v60  ;;  %v1912_v63 = vpop.f32.mrb[13].mxu1 }
 0x3b7   : > { %v3332_v2 = vadd.f32 %v1912_v63, %v1778_v60  ;;  %v2219_v63 = vld [vmem:[%s3583_s11 + $0x8] sm:$0xff] }
 0x3b8   : > { %v2744_v9 = vpack.c.bf16 %v3328_v46, %v3334_v3 }
 0x3b9   : > { %v2742_v5 = vpack.c.bf16 %v3332_v2, %v3330_v0  ;;  %v1916_v8 = vpop.f32.mrb[14].mxu1 }
 0x3ba   : > { %v1918_v10 = vpop.f32.mrb[15].mxu1  ;;  %v3346_v20 = vadd.f32 %v1916_v8, %v1783_v15 }
 0x3bb   : > { %2743 = vmatprep.subr.bf16.mxu1 %v2742_v5  ;;  %v3342_v18 = vadd.f32 %v1918_v10, %v1783_v15  ;;  %v2221_v10 = vld [vmem:[%s3583_s11 + $0x18] sm:$0xff] }
 0x3bc   : > { %2745 = vmatpush1.bf16.msra.mxu1 %v2744_v9  ;;  %3588 = vst [vmem:[#allocation3_spill] sm:$0xff] %v3346_v20 }
 0x3bd   : > { %v1922_v12 = vpop.f32.mrb[16].mxu1  ;;  %3587 = vst [vmem:[#allocation2_spill] sm:$0xff] %v3342_v18 }
 0x3be   : > { %v3340_v16 = vadd.f32 %v1922_v12, %v1788_v14  ;;  %v1924_v17 = vpop.f32.mrb[17].mxu1  ;;  %v2224_v12 = vld [vmem:[%s3583_s11 + $0x30] sm:$0xff] }
 0x3bf   : > { %v3344_v19 = vadd.f32 %v1924_v17, %v1788_v14  ;;  %v2222_v14 = vld [vmem:[%s3583_s11 + $0x20] sm:$0xff] }
 0x3c0   : > { %v2748_v22 = vpack.c.bf16 %v3340_v16, %v3346_v20 }
 0x3c1   : > { %v2746_v21 = vpack.c.bf16 %v3344_v19, %v3342_v18  ;;  %v3355_v24 = vpop.f32.mrb[18].mxu1 }
 0x3c2   : > { %v3357_v25 = vpop.f32.mrb[19].mxu1 }
 0x3c3   : > { %2747 = vmatprep.subr.bf16.mxu1 %v2746_v21 }
 0x3c4   : > { %2749 = vmatpush1.bf16.msra.mxu1 %v2748_v22 }
 0x3c5   : > { %v3359_v26 = vpop.f32.mrb[20].mxu1 }
 0x3c6   : > { %v3361_v27 = vpop.f32.mrb[21].mxu1 }
 0x3c7   : > { %2711 = vmatmul.mubr.msk.f32.vlgmr.msra.gmra.mrb[34].mxu1 %vm2134_vm1, %v2133_v23 }
 0x3c9   : > { %v3363_v28 = vpop.f32.mrb[22].mxu1 }
 0x3ca   : > { %v3365_v29 = vpop.f32.mrb[23].mxu1 }
 0x3cd   : > { %v3367_v30 = vpop.f32.mrb[24].mxu1 }
 0x3ce   : > { %v3369_v31 = vpop.f32.mrb[25].mxu1 }
 0x3d1   : > { %v3371_v32 = vpop.f32.mrb[26].mxu1 }
 0x3d2   : > { %v3373_v33 = vpop.f32.mrb[27].mxu1 }
 0x3d5   : > { %v3375_v34 = vpop.f32.mrb[28].mxu1 }
 0x3d6   : > { %v3377_v35 = vpop.f32.mrb[29].mxu1 }
 0x3d9   : > { %v3379_v36 = vpop.f32.mrb[30].mxu1 }
 0x3da   : > { %3589 = vst [vmem:[#allocation4_spill] sm:$0xff] %v3379_v36  ;;  %v3381_v37 = vpop.f32.mrb[31].mxu1 }
 0x3db   : > { %3590 = vst [vmem:[#allocation5_spill] sm:$0xff] %v3381_v37 }
 0x3dd   : > { %v3383_v11 = vpop.f32.mrb[32].mxu1 }
 0x3de   : > { %v3385_v38 = vpop.f32.mrb[33].mxu1 }
 0x49a   : > { %v2204_v39 = vpop.f32.mrb[34].mxu1 }
 0x49b   : > { %v2209_v13 = vsel %vm636_vm10, %v2204_v39, 0.0  ;;  %v2206_v45 = vpop.f32.mrb[35].mxu1 }
 0x49c   : > { %v2210_v47 = vsel %vm636_vm10, %v2206_v45, 0.0 }
 0x49d   : > { %v2211_v1 = vadd.f32 %v2210_v47, %v2209_v13 }
 0x49f   : > { %2212 = vadd.xlane.f32.xlu0 %v2211_v1 }
 0x52c   : > { %v2213_v48 = vpop.xlane.xlu0 %2212 }
 0x52d   : > { %v2215_v50 = vmul.f32 0.00390625, %v2213_v48 }
 0x52f   : > { %v2216_v52 = vmax.f32 %v2215_v50, 0.0 }
 0x531   : > { %v2217_v54 = vmin.f32 %v2216_v52, 6.0 }
 0x533   : > { %v2249_v58 = vrot.slane %v2217_v54, %v2961_v6  ;;  %v3396_v49 = vrot.slane %v2217_v54, %v2300_v51  ;;  %v2229_v5 = vrot.slane %v2217_v54, %v2964_v7  ;;  %v3414_v6 = vrot.slane %v2217_v54, %v2352_v59  ;;  %v2223_v7 = vld [vmem:[%s3583_s11 + $0x28] sm:$0xff] }
 0x535   : > { %v2302_v60 = vmul.f32 %v3396_v49, %v3393_v44  ;;  %v2250_v61 = vmul.f32 %v2249_v58, %v3393_v44  ;;  %v2309_v8 = vmul.f32 %v3396_v49, %v2225_v62  ;;  %v2251_v9 = vmul.f32 %v2249_v58, %v2219_v63 }
 0x536   : > { %v3432_v15 = vmul.f32 %v2229_v5, %v3393_v44  ;;  %v3434_v17 = vmul.f32 %v2229_v5, %v2219_v63  ;;  %v3436_v21 = vmul.f32 %v2229_v5, %v2220_v4  ;;  %v3438_v22 = vmul.f32 %v2229_v5, %v2221_v10 }
 0x537   : > { %2318 = vrot.lane.b32.xlu0 %v2302_v60, %s2865_s24  ;;  %2266 = vrot.lane.b32.xlu1 %v2250_v61, %s2863_s20  ;;  %v3440_v23 = vmul.f32 %v2229_v5, %v2222_v14  ;;  %v3442_v39 = vmul.f32 %v2229_v5, %v2223_v7  ;;  %v2355_v13 = vmul.f32 %v3414_v6, %v2219_v63  ;;  %v1936_v60 = vld [vmem:[%s3581_s9 + $0x8] sm:$0xff] }
 0x538   : > { %v2252_v45 = vmul.f32 %v2249_v58, %v2220_v4  ;;  %v3445_v47 = vmul.f32 %v2229_v5, %v2224_v12  ;;  %v3447_v1 = vmul.f32 %v2229_v5, %v2225_v62  ;;  %v2357_v48 = vmul.f32 %v3414_v6, %v2221_v10  ;;  %v1938_v5 = vld [vmem:[%s3581_s9 + $0x18] sm:$0xff] }
 0x539   : > { %v2253_v50 = vmul.f32 %v2249_v58, %v2221_v10  ;;  %v2359_v51 = vmul.f32 %v3414_v6, %v2223_v7  ;;  %v2254_v52 = vmul.f32 %v2249_v58, %v2222_v14  ;;  %v2361_v54 = vmul.f32 %v3414_v6, %v2225_v62 }
 0x53a   : > { %v2255_v59 = vmul.f32 %v2249_v58, %v2223_v7  ;;  %v2256_v61 = vmul.f32 %v2249_v58, %v2224_v12 }
 0x53b   : > { %2332 = vrot.lane.b32.xlu0 %v2309_v8, %s2865_s24  ;;  %2268 = vrot.lane.b32.xlu1 %v2251_v9, %s2863_s20  ;;  %v2257_v8 = vmul.f32 %v2249_v58, %v2225_v62  ;;  %v1940_v9 = vld [vmem:[%s3581_s9 + $0x28] sm:$0xff]  ;;  %v2305_v58 = vmul.f32 %v3396_v49, %v2221_v10  ;;  %v2306_v62 = vmul.f32 %v3396_v49, %v2222_v14 }
 0x53c   : > { %v2356_v10 = vmul.f32 %v3414_v6, %v2220_v4 }
 0x53f   : > { %2372 = vrot.lane.b32.xlu0 %v2355_v13, %s2872_s30  ;;  %2270 = vrot.lane.b32.xlu1 %v2252_v45, %s2863_s20  ;;  %v2303_v13 = vmul.f32 %v3396_v49, %v2219_v63  ;;  %v1942_v45 = vld [vmem:[%s3581_s9 + $0x38] sm:$0xff]  ;;  %v2307_v63 = vmul.f32 %v3396_v49, %v2223_v7  ;;  %v2360_v7 = vmul.f32 %v3414_v6, %v2224_v12 }
 0x543   : > { %2376 = vrot.lane.b32.xlu0 %v2357_v48, %s2872_s30  ;;  %2272 = vrot.lane.b32.xlu1 %v2253_v50, %s2863_s20  ;;  %v2304_v48 = vmul.f32 %v3396_v49, %v2220_v4  ;;  %v2308_v50 = vmul.f32 %v3396_v49, %v2224_v12  ;;  %v1935_v49 = vld [vmem:[%s3581_s9] sm:$0xff] }
 0x544   : > { %v1939_v4 = vld [vmem:[%s3581_s9 + $0x20] sm:$0xff] }
 0x547   : > { %2380 = vrot.lane.b32.xlu0 %v2359_v51, %s2872_s30  ;;  %2274 = vrot.lane.b32.xlu1 %v2254_v52, %s2863_s20  ;;  %v2354_v51 = vmul.f32 %v3414_v6, %v3393_v44  ;;  %v2358_v52 = vmul.f32 %v3414_v6, %v2222_v14  ;;  %v1937_v44 = vld [vmem:[%s3581_s9 + $0x10] sm:$0xff] }
 0x548   : > { %v1941_v6 = vld [vmem:[%s3581_s9 + $0x30] sm:$0xff] }
 0x54b   : > { %2384 = vrot.lane.b32.xlu0 %v2361_v54, %s2872_s30  ;;  %2276 = vrot.lane.b32.xlu1 %v2255_v59, %s2863_s20 }
 0x54f   : > { %1950 = vperm.xlu0 %2811, %v1936_v60   ;;  %2278 = vrot.lane.b32.xlu1 %v2256_v61, %s2863_s20 }
 0x553   : > { %1960 = vperm.xlu0 %2811, %v1938_v5   ;;  %2280 = vrot.lane.b32.xlu1 %v2257_v8, %s2863_s20 }
 0x557   : > { %1970 = vperm.xlu0 %2811, %v1940_v9   ;;  %2320 = vrot.lane.b32.xlu1 %v2303_v13, %s2865_s24 }
 0x55b   : > { %1980 = vperm.xlu0 %2811, %v1942_v45   ;;  %2322 = vrot.lane.b32.xlu1 %v2304_v48, %s2865_s24 }
 0x55f   : > { %2324 = vrot.lane.b32.xlu1 %v2305_v58, %s2865_s24 }
 0x563   : > { %2326 = vrot.lane.b32.xlu1 %v2306_v62, %s2865_s24 }
 0x567   : > { %2328 = vrot.lane.b32.xlu1 %v2307_v63, %s2865_s24 }
 0x56b   : > { %2330 = vrot.lane.b32.xlu1 %v2308_v50, %s2865_s24 }
 0x56f   : > { %2370 = vrot.lane.b32.xlu1 %v2354_v51, %s2872_s30 }
 0x573   : > { %2374 = vrot.lane.b32.xlu1 %v2356_v10, %s2872_s30 }
 0x577   : > { %2378 = vrot.lane.b32.xlu1 %v2358_v52, %s2872_s30 }
 0x57b   : > { %2382 = vrot.lane.b32.xlu1 %v2360_v7, %s2872_s30  ;;  %s2722_s30 = sshll.u32 %s3596_s22, 7 }
 0x57c   : > { %s3523_s16 = scalar_lea.vmem %s3584_s12, %s2722_s30 }
 0x57f   : > { %1945 = vperm.xlu1 %2812, %v1935_v49  }
 0x583   : > { %1955 = vperm.xlu1 %2812, %v1937_v44  }
 0x587   : > { %1965 = vperm.xlu1 %2812, %v1939_v4  }
 0x58b   : > { %1975 = vperm.xlu1 %2812, %v1941_v6  }
 0x5a9   : > { %v2267_v14 = vpop.permute.xlu1 %2266  ;;  %v2319_v60 = vpop.permute.xlu0 %2318 }
 0x5ad   : > { %v2269_v12 = vpop.permute.xlu1 %2268  ;;  %v2333_v8 = vpop.permute.xlu0 %2332 }
 0x5ae   : > { %v2291_v48 = vadd.f32 %v2269_v12, %v3434_v17 }
 0x5b1   : > { %v2271_v54 = vpop.permute.xlu1 %2270  ;;  %v2373_v13 = vpop.permute.xlu0 %2372 }
 0x5b5   : > { %v2273_v59 = vpop.permute.xlu1 %2272  ;;  %v2377_v62 = vpop.permute.xlu0 %2376 }
 0x5b6   : > { %v2293_v7 = vadd.f32 %v2273_v59, %v3438_v22  ;;  %v2290_v22 = vadd.f32 %v2267_v14, %v3432_v15 }
 0x5b9   : > { %v2275_v61 = vpop.permute.xlu1 %2274  ;;  %v2381_v49 = vpop.permute.xlu0 %2380 }
 0x5bd   : > { %v2277_v5 = vpop.permute.xlu1 %2276  ;;  %v2385_v37 = vpop.permute.xlu0 %2384 }
 0x5be   : > { %v2295_v12 = vadd.f32 %v2277_v5, %v3442_v39 }
 0x5c1   : > { %v2279_v9 = vpop.permute.xlu1 %2278 }
 0x5c5   : > { %v2281_v45 = vpop.permute.xlu1 %2280 }
 0x5c6   : > { %v2297_v52 = vadd.f32 %v2281_v45, %v3447_v1 }
 0x5c8   : > { %v2349_v6 = vadd.f32 %v2333_v8, %v2297_v52  ;;  %v2342_v8 = vadd.f32 %v2319_v60, %v2290_v22 }
 0x5c9   : > { %v2321_v58 = vpop.permute.xlu1 %2320 }
 0x5ca   : > { %v2343_v63 = vadd.f32 %v2321_v58, %v2291_v48  ;;  %v2401_v17 = vadd.f32 %v2385_v37, %v2349_v6  ;;  %v2292_v37 = vadd.f32 %v2271_v54, %v3436_v21 }
 0x5cc   : > { %v2395_v50 = vadd.f32 %v2373_v13, %v2343_v63  ;;  %v2719_v63 = vmul.f32 -1.442695, %v2401_v17  ;;  %v2296_v17 = vadd.f32 %v2279_v9, %v3445_v47 }
 0x5cd   : > { %v2323_v51 = vpop.permute.xlu1 %2322 }
 0x5ce   : > { %v2713_v10 = vmul.f32 -1.442695, %v2395_v50  ;;  %v2344_v5 = vadd.f32 %v2323_v51, %v2292_v37 }
 0x5d0   : > { %2813 = vpow2.f32 %v2713_v10 }
 0x5d1   : > { %v2325_v44 = vpop.permute.xlu1 %2324 }
 0x5d2   : > { %v2345_v4 = vadd.f32 %v2325_v44, %v2293_v7  ;;  %v2294_v7 = vadd.f32 %v2275_v61, %v3440_v23 }
 0x5d4   : > { %v2397_v18 = vadd.f32 %v2377_v62, %v2345_v4 }
 0x5d5   : > { %v2327_v20 = vpop.permute.xlu1 %2326 }
 0x5d6   : > { %v2715_v36 = vmul.f32 -1.442695, %v2397_v18 }
 0x5d8   : > { %2815 = vpow2.f32 %v2715_v36 }
 0x5d9   : > { %v2329_v13 = vpop.permute.xlu1 %2328 }
 0x5da   : > { %v2814_v48 = vpop.eup %2813  ;;  %v2347_v58 = vadd.f32 %v2329_v13, %v2295_v12 }
 0x5db   : > { %v2427_v1 = vadd.f32 1.0, %v2814_v48 }
 0x5dc   : > { %v2399_v59 = vadd.f32 %v2381_v49, %v2347_v58  ;;  %v2346_v49 = vadd.f32 %v2327_v20, %v2294_v7 }
 0x5dd   : > { %2817 = vrcp.f32 %v2427_v1  ;;  %v2331_v45 = vpop.permute.xlu1 %2330 }
 0x5de   : > { %v2717_v50 = vmul.f32 -1.442695, %v2399_v59  ;;  %2819 = vpow2.f32 %v2719_v63  ;;  %v2348_v51 = vadd.f32 %v2331_v45, %v2296_v17 }
 0x5e0   : > { %2821 = vpow2.f32 %v2717_v50 }
 0x5e1   : > { %v2371_v62 = vpop.permute.xlu1 %2370 }
 0x5e2   : > { %v2816_v18 = vpop.eup %2815  ;;  %v2394_v39 = vadd.f32 %v2371_v62, %v2342_v8 }
 0x5e3   : > { %v2429_v36 = vadd.f32 1.0, %v2816_v18 }
 0x5e4   : > { %v2712_v10 = vmul.f32 -1.442695, %v2394_v39 }
 0x5e5   : > { %2823 = vrcp.f32 %v2429_v36  ;;  %v2375_v52 = vpop.permute.xlu1 %2374  ;;  %v1951_v36 = vpop.permute.xlu0 %1950 }
 0x5e6   : > { %2825 = vpow2.f32 %v2712_v10  ;;  %v2396_v15 = vadd.f32 %v2375_v52, %v2344_v5 }
 0x5e7   : > { %v2818_v14 = vpop.eup %2817 }
 0x5e8   : > { %v2714_v44 = vmul.f32 -1.442695, %v2396_v15  ;;  %2457 = vperm.xlu0 %2811, %v2818_v14   ;;  %v2820_v4 = vpop.eup %2819  ;;  %v2093_v14 = vadd.f32 %v3359_v26, %v1951_v36 }
 0x5e9   : > { %v2379_v60 = vpop.permute.xlu1 %2378  ;;  %v2433_v13 = vadd.f32 1.0, %v2820_v4  ;;  %v1961_v5 = vpop.permute.xlu0 %1960 }
 0x5ea   : > { %v2822_v6 = vpop.eup %2821  ;;  %2827 = vpow2.f32 %v2714_v44  ;;  %v2398_v21 = vadd.f32 %v2379_v60, %v2346_v49  ;;  %v2095_v49 = vadd.f32 %v3361_v27, %v1951_v36 }
 0x5eb   : > { %v2431_v54 = vadd.f32 1.0, %v2822_v6 }
 0x5ec   : > { %v2716_v12 = vmul.f32 -1.442695, %v2398_v21 }
 0x5ed   : > { %2829 = vrcp.f32 %v2431_v54  ;;  %v2383_v48 = vpop.permute.xlu1 %2382  ;;  %v1971_v10 = vpop.permute.xlu0 %1970 }
 0x5ee   : > { %2831 = vpow2.f32 %v2716_v12  ;;  %v2400_v23 = vadd.f32 %v2383_v48, %v2348_v51 }
 0x5ef   : > { %v2824_v61 = vpop.eup %2823  ;;  %2833 = vrcp.f32 %v2433_v13 }
 0x5f0   : > { %v2826_v58 = vpop.eup %2825  ;;  %v2718_v20 = vmul.f32 -1.442695, %v2400_v23  ;;  %2467 = vperm.xlu0 %2811, %v2824_v61  }
 0x5f1   : > { %v2426_v63 = vadd.f32 1.0, %v2826_v58  ;;  %v1981_v52 = vpop.permute.xlu0 %1980 }
 0x5f2   : > { %2835 = vpow2.f32 %v2718_v20 }
 0x5f3   : > { %2837 = vrcp.f32 %v2426_v63 }
 0x5f4   : > { %v2828_v1 = vpop.eup %2827 }
 0x5f5   : > { %v2428_v47 = vadd.f32 1.0, %v2828_v1 }
 0x5f7   : > { %v2830_v9 = vpop.eup %2829  ;;  %2839 = vrcp.f32 %v2428_v47 }
 0x5f8   : > { %v2832_v22 = vpop.eup %2831  ;;  %2477 = vperm.xlu0 %2811, %v2830_v9   ;;  %v2119_v9 = vadd.f32 %v3377_v35, %v1971_v10 }
 0x5f9   : > { %v2430_v59 = vadd.f32 1.0, %v2832_v22  ;;  %v2834_v45 = vpop.eup %2833 }
 0x5fb   : > { %2841 = vrcp.f32 %v2430_v59 }
 0x5fc   : > { %v2836_v50 = vpop.eup %2835  ;;  %2487 = vperm.xlu0 %2811, %v2834_v45   ;;  %v2129_v45 = vadd.f32 %v3383_v11, %v1981_v52 }
 0x5fd   : > { %v2838_v8 = vpop.eup %2837  ;;  %v2432_v62 = vadd.f32 1.0, %v2836_v50  ;;  %v2131_v50 = vadd.f32 %v3385_v38, %v1981_v52 }
 0x5fe   : > { %2452 = vperm.xlu1 %2812, %v2838_v8   ;;  %v1946_v7 = vpop.permute.xlu1 %1945 }
 0x5ff   : > { %2843 = vrcp.f32 %v2432_v62  ;;  %v2089_v11 = vadd.f32 %v3357_v25, %v1946_v7 }
 0x601   : > { %v2840_v18 = vpop.eup %2839 }
 0x602   : > { %2462 = vperm.xlu1 %2812, %v2840_v18   ;;  %v1956_v54 = vpop.permute.xlu1 %1955 }
 0x605   : > { %v2842_v37 = vpop.eup %2841 }
 0x606   : > { %2472 = vperm.xlu1 %2812, %v2842_v37   ;;  %v1966_v61 = vpop.permute.xlu1 %1965 }
 0x609   : > { %v2844_v39 = vpop.eup %2843 }
 0x60a   : > { %2482 = vperm.xlu1 %2812, %v2844_v39   ;;  %v1976_v22 = vpop.permute.xlu1 %1975 }
 0x667   : > { %v2458_v15 = vpop.permute.xlu0 %2457 }
 0x668   : > { %v2492_v44 = vmul.f32 %v2458_v15, %v3304_v40  ;;  %v2493_v4 = vmul.f32 %v2458_v15, %v3308_v42  ;;  %v2105_v40 = vadd.f32 %v3367_v30, %v1961_v5  ;;  %v2107_v42 = vadd.f32 %v3369_v31, %v1961_v5 }
 0x669   : > { %v2117_v30 = vadd.f32 %v3375_v34, %v1971_v10  ;;  %v2087_v5 = vadd.f32 %v3355_v24, %v1946_v7  ;;  %v2101_v15 = vadd.f32 %v3365_v29, %v1956_v54  ;;  %v2113_v29 = vadd.f32 %v3373_v33, %v1966_v61  ;;  %v3591_v33 = vld [vmem:[#allocation4_spill] sm:$0xff] }
 0x66a   : > { %v2508_v60 = vadd.f32 %v2492_v44, %v2093_v14  ;;  %v2509_v6 = vadd.f32 %v2493_v4, %v2095_v49 }
 0x66c   : > { %v2524_v17 = vmax.f32 %v2508_v60, 0.0  ;;  %v2525_v21 = vmax.f32 %v2509_v6, 0.0 }
 0x66e   : > { %v2540_v26 = vmin.f32 %v2524_v17, 6.0  ;;  %v2541_v51 = vmin.f32 %v2525_v21, 6.0 }
 0x66f   : > { %v2468_v27 = vpop.permute.xlu0 %2467 }
 0x670   : > { %2556 = vst [vmem:[%s3523_s16 + $0x10] sm:$0xff] %v2540_v26  ;;  %2557 = vst [vmem:[%s3523_s16 + $0x18] sm:$0xff] %v2541_v51  ;;  %v2496_v12 = vmul.f32 %v2468_v27, %v3316_v53  ;;  %v2497_v13 = vmul.f32 %v2468_v27, %v3320_v56 }
 0x672   : > { %v2512_v48 = vadd.f32 %v2496_v12, %v2105_v40  ;;  %v2513_v23 = vadd.f32 %v2497_v13, %v2107_v42  ;;  %v2123_v12 = vadd.f32 %v3591_v33, %v1976_v22  ;;  %v3592_v13 = vld [vmem:[#allocation5_spill] sm:$0xff] }
 0x674   : > { %v2528_v58 = vmax.f32 %v2512_v48, 0.0  ;;  %v2529_v20 = vmax.f32 %v2513_v23, 0.0  ;;  %v2125_v48 = vadd.f32 %v3592_v13, %v1976_v22 }
 0x676   : > { %v2544_v63 = vmin.f32 %v2528_v58, 6.0  ;;  %v2545_v1 = vmin.f32 %v2529_v20, 6.0  ;;  %v3594_v20 = vld [vmem:[#allocation2_spill] sm:$0xff] }
 0x677   : > { %v2478_v47 = vpop.permute.xlu0 %2477 }
 0x678   : > { %2560 = vst [vmem:[%s3523_s16 + $0x30] sm:$0xff] %v2544_v63  ;;  %2561 = vst [vmem:[%s3523_s16 + $0x38] sm:$0xff] %v2545_v1  ;;  %v2500_v31 = vmul.f32 %v2478_v47, %v3328_v46  ;;  %v2501_v53 = vmul.f32 %v2478_v47, %v3332_v2 }
 0x67a   : > { %v2516_v56 = vadd.f32 %v2500_v31, %v2117_v30  ;;  %v2517_v59 = vadd.f32 %v2501_v53, %v2119_v9 }
 0x67b   : > { %v2488_v8 = vpop.permute.xlu0 %2487 }
 0x67c   : > { %v2532_v62 = vmax.f32 %v2516_v56, 0.0  ;;  %v2533_v34 = vmax.f32 %v2517_v59, 0.0  ;;  %v2504_v35 = vmul.f32 %v2488_v8, %v3340_v16  ;;  %v2505_v18 = vmul.f32 %v2488_v8, %v3344_v19 }
 0x67d   : > { %v2453_v37 = vpop.permute.xlu1 %2452  ;;  %v2099_v19 = vadd.f32 %v3363_v28, %v1956_v54  ;;  %v2111_v28 = vadd.f32 %v3371_v32, %v1966_v61 }
 0x67e   : > { %v2548_v46 = vmin.f32 %v2532_v62, 6.0  ;;  %v2549_v39 = vmin.f32 %v2533_v34, 6.0  ;;  %v2520_v2 = vadd.f32 %v2504_v35, %v2129_v45  ;;  %v2521_v36 = vadd.f32 %v2505_v18, %v2131_v50 }
 0x67f   : > { %v2490_v10 = vmul.f32 %v2453_v37, %v3310_v43  ;;  %v2491_v38 = vmul.f32 %v2453_v37, %v3306_v41 }
 0x680   : > { %2564 = vst [vmem:[%s3523_s16 + $0x50] sm:$0xff] %v2548_v46  ;;  %2565 = vst [vmem:[%s3523_s16 + $0x58] sm:$0xff] %v2549_v39  ;;  %v2536_v16 = vmax.f32 %v2520_v2, 0.0  ;;  %v2537_v52 = vmax.f32 %v2521_v36, 0.0 }
 0x681   : > { %v2506_v14 = vadd.f32 %v2490_v10, %v2087_v5  ;;  %v2507_v49 = vadd.f32 %v2491_v38, %v2089_v11  ;;  %v2463_v44 = vpop.permute.xlu1 %2462 }
 0x682   : > { %v2552_v24 = vmin.f32 %v2536_v16, 6.0  ;;  %v2553_v4 = vmin.f32 %v2537_v52, 6.0  ;;  %v2494_v25 = vmul.f32 %v2463_v44, %v3322_v57  ;;  %v2495_v43 = vmul.f32 %v2463_v44, %v3318_v55 }
 0x683   : > { %v2522_v41 = vmax.f32 %v2506_v14, 0.0  ;;  %v2523_v7 = vmax.f32 %v2507_v49, 0.0 }
 0x684   : > { %2568 = vst [vmem:[%s3523_s16 + $0x70] sm:$0xff] %v2552_v24  ;;  %2569 = vst [vmem:[%s3523_s16 + $0x78] sm:$0xff] %v2553_v4  ;;  %v2510_v60 = vadd.f32 %v2494_v25, %v2099_v19  ;;  %v2511_v6 = vadd.f32 %v2495_v43, %v2101_v15 }
 0x685   : > { %v2538_v17 = vmin.f32 %v2522_v41, 6.0  ;;  %v2539_v21 = vmin.f32 %v2523_v7, 6.0  ;;  %v2473_v54 = vpop.permute.xlu1 %2472 }
 0x686   : > { %v2526_v57 = vmax.f32 %v2510_v60, 0.0  ;;  %v2527_v26 = vmax.f32 %v2511_v6, 0.0  ;;  %v2498_v55 = vmul.f32 %v2473_v54, %v3334_v3  ;;  %v2499_v51 = vmul.f32 %v2473_v54, %v3330_v0  ;;  %v3593_v0 = vld [vmem:[#allocation3_spill] sm:$0xff] }
 0x687   : > { %2554 = vst [vmem:[%s3523_s16] sm:$0xff] %v2538_v17  ;;  %2555 = vst [vmem:[%s3523_s16 + $0x8] sm:$0xff] %v2539_v21 }
 0x688   : > { %v2542_v27 = vmin.f32 %v2526_v57, 6.0  ;;  %v2543_v40 = vmin.f32 %v2527_v26, 6.0  ;;  %v2514_v42 = vadd.f32 %v2498_v55, %v2111_v28  ;;  %v2515_v32 = vadd.f32 %v2499_v51, %v2113_v29 }
 0x689   : > { %v2483_v23 = vpop.permute.xlu1 %2482 }
 0x68a   : > { %2558 = vst [vmem:[%s3523_s16 + $0x20] sm:$0xff] %v2542_v27  ;;  %2559 = vst [vmem:[%s3523_s16 + $0x28] sm:$0xff] %v2543_v40  ;;  %v2530_v3 = vmax.f32 %v2514_v42, 0.0  ;;  %v2531_v61 = vmax.f32 %v2515_v32, 0.0  ;;  %v2502_v58 = vmul.f32 %v2483_v23, %v3593_v0  ;;  %v2503_v63 = vmul.f32 %v2483_v23, %v3594_v20 }
 0x68c   : > { %v2546_v1 = vmin.f32 %v2530_v3, 6.0  ;;  %v2547_v47 = vmin.f32 %v2531_v61, 6.0  ;;  %v2518_v30 = vadd.f32 %v2502_v58, %v2123_v12  ;;  %v2519_v9 = vadd.f32 %v2503_v63, %v2125_v48 }
 0x68e   : > { %2562 = vst [vmem:[%s3523_s16 + $0x40] sm:$0xff] %v2546_v1  ;;  %2563 = vst [vmem:[%s3523_s16 + $0x48] sm:$0xff] %v2547_v47  ;;  %v2534_v31 = vmax.f32 %v2518_v30, 0.0  ;;  %v2535_v53 = vmax.f32 %v2519_v9, 0.0 }
 0x690   : > { %v2550_v22 = vmin.f32 %v2534_v31, 6.0  ;;  %v2551_v56 = vmin.f32 %v2535_v53, 6.0 }
 0x692   : > { %2566 = vst [vmem:[%s3523_s16 + $0x60] sm:$0xff] %v2550_v22  ;;  %2567 = vst [vmem:[%s3523_s16 + $0x68] sm:$0xff] %v2551_v56 }
 0x693 PF: > { %s22_s21 = sadd.s32 1, %s2851_s21  }
 0x694   : > { %p19_p4 = scmp.ge.s32.totalorder %s22_s21, 4  }
 0x696   :  { %21 = sbr.rel (!%p19_p4) target bundleno = 1 (0x1), region = 114 }

</bundles_post_ra>
